<compile_context>
chip_gen: v5e
topology: v5e:2x2
jax: 0.10.0
libtpu: 0.0.40
codegen_flags: <defaults>
</compile_context>

<pallas_src>
import functools

import jax
import jax.numpy as jnp
from jax.experimental import pallas as pl
from jax.experimental.pallas import tpu as pltpu


# Layer sizes of the autoencoder: encoder then decoder.
LAYER_DIMS = [784, 128, 64, 36, 16, 36, 64, 128, 784]
NUM_LAYERS = len(LAYER_DIMS) - 1  # 8 Linear layers
LANE = 128

D_IN, D_OUT = LAYER_DIMS[0], LAYER_DIMS[-1]


def _round_up(x, m):
    return (x + m - 1) // m * m


def _pad_hidden(d):
    # Ragged hidden dims (36, 16) -> 128.  64 already maps cleanly onto the
    # MXU / half a vreg, so leave it alone.
    if d % LANE == 0 or d == 64:
        return d
    return _round_up(d, LANE)


# Only hidden dims are padded; the 784 ends stay exact:
# [784, 128, 64, 128, 128, 128, 64, 128, 784]
PADDED_DIMS = (
    [LAYER_DIMS[0]]
    + [_pad_hidden(d) for d in LAYER_DIMS[1:-1]]
    + [LAYER_DIMS[-1]]
)


def autoencoder_kernel(x_ref, *refs):
    """Full MLP autoencoder forward on one batch tile.

    refs = (w0, b0, w1, b1, ..., w7, b7, out_ref)
    Weights are bf16 (MXU operands), biases f32; accumulation and all
    elementwise math (bias add / ReLU / sigmoid) stay in f32.
    """
    out_ref = refs[-1]
    param_refs = refs[:-1]

    h = x_ref[...]  # (TILE_B, 784), f32 or bf16
    for i in range(NUM_LAYERS):
        w = param_refs[2 * i][...]          # (in_pad, out_pad) bf16
        b = param_refs[2 * i + 1][...]      # (1, out_pad)      f32
        y = jnp.dot(h.astype(jnp.bfloat16), w,
                    preferred_element_type=jnp.float32) + b
        if i == NUM_LAYERS - 1:             # final layer -> Sigmoid
            h = jax.nn.sigmoid(y)
        elif i == 3:                        # bottleneck (16-d code) -> identity
            h = y
        else:                               # encoder/decoder hidden -> ReLU
            h = jnp.maximum(y, 0.0)
    out_ref[...] = h.astype(out_ref.dtype)


def _tile_config():
    """(tile_b, vmem_limit_bytes, min_grid_steps) tuned per TPU generation."""
    try:
        kind = jax.devices()[0].device_kind.lower()
    except Exception:  # pragma: no cover - defensive
        kind = ""
    if "v7" in kind:
        # 64 MiB VMEM per TC, 2 TCs: smaller tiles, and keep >=2 grid steps so
        # the "parallel" batch axis shards across both TensorCores.
        return 1024, 56 * 1024 * 1024, 2
    if "v5" in kind or "v6" in kind:
        # 128 MiB VMEM, 1 TC: large tiles amortize ~0.35 us per-step overhead.
        return 2048, 96 * 1024 * 1024, 1
    # Unknown / future chips: conservative config that fits a 64 MiB VMEM.
    return 1024, 56 * 1024 * 1024, 2


@functools.partial(jax.jit, static_argnames=("tile_b", "vmem_limit_bytes"))
def _forward_impl(x2d, flat_params, *, tile_b, vmem_limit_bytes):
    B = x2d.shape[0]
    grid = (pl.cdiv(B, tile_b),)

    in_specs = [pl.BlockSpec((tile_b, D_IN), lambda i: (i, 0))]
    for p in flat_params:
        # Constant index_map -> parameters are DMA'd once and stay resident in
        # VMEM across every batch tile (never re-fetched).
        in_specs.append(pl.BlockSpec(p.shape, lambda i: (0, 0)))

    return pl.pallas_call(
        autoencoder_kernel,
        out_shape=jax.ShapeDtypeStruct((B, D_OUT), jnp.float32),
        grid=grid,
        in_specs=in_specs,
        out_specs=pl.BlockSpec((tile_b, D_OUT), lambda i: (i, 0)),
        compiler_params=pltpu.CompilerParams(
            dimension_semantics=("parallel",),
            vmem_limit_bytes=vmem_limit_bytes,
        ),
    )(x2d, *flat_params)


def autoencoder_forward(x_nchw, params, *, tile_b=None, vmem_limit_bytes=None):
    """x_nchw: (B, 1, 28, 28) -> (B, 1, 28, 28) float32."""
    B = x_nchw.shape[0]

    d_tile, d_vmem, min_steps = _tile_config()
    if tile_b is None:
        tile_b = d_tile
    if vmem_limit_bytes is None:
        vmem_limit_bytes = d_vmem

    # Clamp for small batches; on multi-TC chips keep >= min_steps grid steps
    # so both TensorCores get work.
    tile_b = min(tile_b, _round_up(B, 8))
    if min_steps > 1 and B > 8:
        tile_b = min(tile_b, _round_up(pl.cdiv(B, min_steps), 8))
    tile_b = max(tile_b, 8)

    # Flatten exactly like torch x.view(-1, 784).  No pad, no dtype cast:
    # the kernel reads (B, 784) directly (bf16 input passes straight through).
    x2d = x_nchw.reshape(B, D_IN)

    flat_params = []
    for (w, b) in params:
        flat_params += [w, b]

    out2d = _forward_impl(x2d, tuple(flat_params), tile_b=tile_b,
                          vmem_limit_bytes=vmem_limit_bytes)
    return out2d.reshape(B, 1, 28, 28)


def init_params(key):
    """Deterministic init mimicking PyTorch nn.Linear defaults:
    W, b ~ U(-1/sqrt(fan_in), 1/sqrt(fan_in)), weights stored (in, out).

    Returns (kernel_params, raw_params):
      kernel_params: hidden dims padded to 128, weights bf16, biases (1, out_pad) f32.
      raw_params:    unpadded f32 (used by the pure-JAX reference check).
    """
    kernel_params, raw_params = [], []
    for i in range(NUM_LAYERS):
        fan_in, fan_out = LAYER_DIMS[i], LAYER_DIMS[i + 1]
        pin, pout = PADDED_DIMS[i], PADDED_DIMS[i + 1]
        key, kw, kb = jax.random.split(key, 3)
        bound = 1.0 / jnp.sqrt(jnp.float32(fan_in))
        w = jax.random.uniform(kw, (fan_in, fan_out), jnp.float32,
                               minval=-bound, maxval=bound)
        b = jax.random.uniform(kb, (fan_out,), jnp.float32,
                               minval=-bound, maxval=bound)
        raw_params.append((w, b))

        # Zero-padded rows/cols contribute exact zeros; zero bias on padded
        # columns keeps padded hidden activations at 0 through ReLU / identity.
        # The final layer has pout == 784 (unpadded), so no padded columns ever
        # reach the sigmoid output.
        w_p = jnp.zeros((pin, pout), jnp.float32).at[:fan_in, :fan_out].set(w)
        b_p = jnp.zeros((1, pout), jnp.float32).at[0, :fan_out].set(b)
        kernel_params.append((w_p.astype(jnp.bfloat16), b_p))
    return kernel_params, raw_params


def autoencoder_ref(x_nchw, raw_params):
    """Pure-JAX f32 reference matching the PyTorch forward pass."""
    B = x_nchw.shape[0]
    h = x_nchw.reshape(B, D_IN).astype(jnp.float32)
    for i, (w, b) in enumerate(raw_params):
        h = h @ w + b
        if i == NUM_LAYERS - 1:
            h = jax.nn.sigmoid(h)
        elif i != 3:
            h = jnp.maximum(h, 0.0)
    return h.reshape(B, 1, 28, 28)


if __name__ == "__main__":
    key = jax.random.PRNGKey(0)
    key, kx = jax.random.split(key)

    B = 2
    x = jax.random.normal(kx, (B, 1, 28, 28), jnp.float32)  # NCHW, like PyTorch

    kernel_params, raw_params = init_params(key)

    out = autoencoder_forward(x, kernel_params)
    out = jax.block_until_ready(out)

    assert out.shape == (B, 1, 28, 28), out.shape
    assert out.dtype == jnp.float32
    # Sigmoid output lies in [0, 1] and must be finite.
    assert bool(jnp.all(jnp.isfinite(out)))
    assert bool(jnp.all(out >= 0.0)) and bool(jnp.all(out <= 1.0))

    # Numerical check vs. full-precision reference (drift only from bf16
    # matmul operands with f32 accumulation, compounding over 8 layers).
    ref = jax.block_until_ready(autoencoder_ref(x, raw_params))
    assert bool(jnp.max(jnp.abs(out - ref)) < 2e-2), float(
        jnp.max(jnp.abs(out - ref)))

    print("KERNEL_OK")
</pallas_src>

<mosaic_0001>
module attributes {stable_mosaic.version = 11 : i64} {
  func.func @autoencoder_kernel(%arg0: i32, %arg1: memref<8x784xf32, #tpu.memory_space<vmem>>, %arg2: memref<784x128xbf16, #tpu.memory_space<vmem>>, %arg3: memref<1x128xf32, #tpu.memory_space<vmem>>, %arg4: memref<128x64xbf16, #tpu.memory_space<vmem>>, %arg5: memref<1x64xf32, #tpu.memory_space<vmem>>, %arg6: memref<64x128xbf16, #tpu.memory_space<vmem>>, %arg7: memref<1x128xf32, #tpu.memory_space<vmem>>, %arg8: memref<128x128xbf16, #tpu.memory_space<vmem>>, %arg9: memref<1x128xf32, #tpu.memory_space<vmem>>, %arg10: memref<128x128xbf16, #tpu.memory_space<vmem>>, %arg11: memref<1x128xf32, #tpu.memory_space<vmem>>, %arg12: memref<128x64xbf16, #tpu.memory_space<vmem>>, %arg13: memref<1x64xf32, #tpu.memory_space<vmem>>, %arg14: memref<64x128xbf16, #tpu.memory_space<vmem>>, %arg15: memref<1x128xf32, #tpu.memory_space<vmem>>, %arg16: memref<128x784xbf16, #tpu.memory_space<vmem>>, %arg17: memref<1x784xf32, #tpu.memory_space<vmem>>, %arg18: memref<8x784xf32, #tpu.memory_space<vmem>>) attributes {dimension_semantics = [#tpu.dimension_semantics<parallel>], iteration_bounds = array<i64: 1>, scalar_prefetch = 0 : i64, scratch_operands = 0 : i64, tpu.core_type = #tpu.core_type<tc>, window_params = [{transform_indices = @transform_0, window_bounds = array<i64: 8, 784>}, {pipeline_mode = #tpu.pipeline_mode<synchronous>, transform_indices = @transform_1, window_bounds = array<i64: 784, 128>}, {pipeline_mode = #tpu.pipeline_mode<synchronous>, transform_indices = @transform_2, window_bounds = array<i64: 1, 128>}, {pipeline_mode = #tpu.pipeline_mode<synchronous>, transform_indices = @transform_3, window_bounds = array<i64: 128, 64>}, {pipeline_mode = #tpu.pipeline_mode<synchronous>, transform_indices = @transform_4, window_bounds = array<i64: 1, 64>}, {pipeline_mode = #tpu.pipeline_mode<synchronous>, transform_indices = @transform_5, window_bounds = array<i64: 64, 128>}, {pipeline_mode = #tpu.pipeline_mode<synchronous>, transform_indices = @transform_6, window_bounds = array<i64: 1, 128>}, {pipeline_mode = #tpu.pipeline_mode<synchronous>, transform_indices = @transform_7, window_bounds = array<i64: 128, 128>}, {pipeline_mode = #tpu.pipeline_mode<synchronous>, transform_indices = @transform_8, window_bounds = array<i64: 1, 128>}, {pipeline_mode = #tpu.pipeline_mode<synchronous>, transform_indices = @transform_9, window_bounds = array<i64: 128, 128>}, {pipeline_mode = #tpu.pipeline_mode<synchronous>, transform_indices = @transform_10, window_bounds = array<i64: 1, 128>}, {pipeline_mode = #tpu.pipeline_mode<synchronous>, transform_indices = @transform_11, window_bounds = array<i64: 128, 64>}, {pipeline_mode = #tpu.pipeline_mode<synchronous>, transform_indices = @transform_12, window_bounds = array<i64: 1, 64>}, {pipeline_mode = #tpu.pipeline_mode<synchronous>, transform_indices = @transform_13, window_bounds = array<i64: 64, 128>}, {pipeline_mode = #tpu.pipeline_mode<synchronous>, transform_indices = @transform_14, window_bounds = array<i64: 1, 128>}, {pipeline_mode = #tpu.pipeline_mode<synchronous>, transform_indices = @transform_15, window_bounds = array<i64: 128, 784>}, {pipeline_mode = #tpu.pipeline_mode<synchronous>, transform_indices = @transform_16, window_bounds = array<i64: 1, 784>}, {transform_indices = @transform_17, window_bounds = array<i64: 8, 784>}]} {
    %c0 = arith.constant 0 : index
    %c0_0 = arith.constant 0 : index
    %0 = vector.load %arg1[%c0, %c0_0] : memref<8x784xf32, #tpu.memory_space<vmem>>, vector<8x784xf32>
    %c0_1 = arith.constant 0 : index
    %c0_2 = arith.constant 0 : index
    %1 = vector.load %arg2[%c0_1, %c0_2] : memref<784x128xbf16, #tpu.memory_space<vmem>>, vector<784x128xbf16>
    %c0_3 = arith.constant 0 : index
    %c0_4 = arith.constant 0 : index
    %2 = vector.load %arg3[%c0_3, %c0_4] : memref<1x128xf32, #tpu.memory_space<vmem>>, vector<1x128xf32>
    %3 = arith.truncf %0 : vector<8x784xf32> to vector<8x784xbf16>
    %cst = arith.constant dense<0.000000e+00> : vector<8x128xf32>
    %4 = tpu.matmul %3, %1, %cst {dimension_numbers = #tpu.dot_dimension_numbers<[1], [0], [0], [1], [0, 0, 1, 1], [], []>} : vector<8x784xbf16>, vector<784x128xbf16>, vector<8x128xf32> -> vector<8x128xf32>
    %5 = vector.broadcast %2 : vector<1x128xf32> to vector<8x128xf32>
    %6 = arith.addf %4, %5 : vector<8x128xf32>
    %cst_5 = arith.constant 0.000000e+00 : f32
    %7 = vector.broadcast %cst_5 : f32 to vector<8x128xf32>
    %8 = arith.maximumf %6, %7 : vector<8x128xf32>
    %c0_6 = arith.constant 0 : index
    %c0_7 = arith.constant 0 : index
    %9 = vector.load %arg4[%c0_6, %c0_7] : memref<128x64xbf16, #tpu.memory_space<vmem>>, vector<128x64xbf16>
    %c0_8 = arith.constant 0 : index
    %c0_9 = arith.constant 0 : index
    %10 = vector.load %arg5[%c0_8, %c0_9] : memref<1x64xf32, #tpu.memory_space<vmem>>, vector<1x64xf32>
    %11 = arith.truncf %8 : vector<8x128xf32> to vector<8x128xbf16>
    %cst_10 = arith.constant dense<0.000000e+00> : vector<8x64xf32>
    %12 = tpu.matmul %11, %9, %cst_10 {dimension_numbers = #tpu.dot_dimension_numbers<[1], [0], [0], [1], [0, 0, 1, 1], [], []>} : vector<8x128xbf16>, vector<128x64xbf16>, vector<8x64xf32> -> vector<8x64xf32>
    %13 = vector.broadcast %10 : vector<1x64xf32> to vector<8x64xf32>
    %14 = arith.addf %12, %13 : vector<8x64xf32>
    %cst_11 = arith.constant 0.000000e+00 : f32
    %15 = vector.broadcast %cst_11 : f32 to vector<8x64xf32>
    %16 = arith.maximumf %14, %15 : vector<8x64xf32>
    %c0_12 = arith.constant 0 : index
    %c0_13 = arith.constant 0 : index
    %17 = vector.load %arg6[%c0_12, %c0_13] : memref<64x128xbf16, #tpu.memory_space<vmem>>, vector<64x128xbf16>
    %c0_14 = arith.constant 0 : index
    %c0_15 = arith.constant 0 : index
    %18 = vector.load %arg7[%c0_14, %c0_15] : memref<1x128xf32, #tpu.memory_space<vmem>>, vector<1x128xf32>
    %19 = arith.truncf %16 : vector<8x64xf32> to vector<8x64xbf16>
    %cst_16 = arith.constant dense<0.000000e+00> : vector<8x128xf32>
    %20 = tpu.matmul %19, %17, %cst_16 {dimension_numbers = #tpu.dot_dimension_numbers<[1], [0], [0], [1], [0, 0, 1, 1], [], []>} : vector<8x64xbf16>, vector<64x128xbf16>, vector<8x128xf32> -> vector<8x128xf32>
    %21 = vector.broadcast %18 : vector<1x128xf32> to vector<8x128xf32>
    %22 = arith.addf %20, %21 : vector<8x128xf32>
    %cst_17 = arith.constant 0.000000e+00 : f32
    %23 = vector.broadcast %cst_17 : f32 to vector<8x128xf32>
    %24 = arith.maximumf %22, %23 : vector<8x128xf32>
    %c0_18 = arith.constant 0 : index
    %c0_19 = arith.constant 0 : index
    %25 = vector.load %arg8[%c0_18, %c0_19] : memref<128x128xbf16, #tpu.memory_space<vmem>>, vector<128x128xbf16>
    %c0_20 = arith.constant 0 : index
    %c0_21 = arith.constant 0 : index
    %26 = vector.load %arg9[%c0_20, %c0_21] : memref<1x128xf32, #tpu.memory_space<vmem>>, vector<1x128xf32>
    %27 = arith.truncf %24 : vector<8x128xf32> to vector<8x128xbf16>
    %cst_22 = arith.constant dense<0.000000e+00> : vector<8x128xf32>
    %28 = tpu.matmul %27, %25, %cst_22 {dimension_numbers = #tpu.dot_dimension_numbers<[1], [0], [0], [1], [0, 0, 1, 1], [], []>} : vector<8x128xbf16>, vector<128x128xbf16>, vector<8x128xf32> -> vector<8x128xf32>
    %29 = vector.broadcast %26 : vector<1x128xf32> to vector<8x128xf32>
    %30 = arith.addf %28, %29 : vector<8x128xf32>
    %c0_23 = arith.constant 0 : index
    %c0_24 = arith.constant 0 : index
    %31 = vector.load %arg10[%c0_23, %c0_24] : memref<128x128xbf16, #tpu.memory_space<vmem>>, vector<128x128xbf16>
    %c0_25 = arith.constant 0 : index
    %c0_26 = arith.constant 0 : index
    %32 = vector.load %arg11[%c0_25, %c0_26] : memref<1x128xf32, #tpu.memory_space<vmem>>, vector<1x128xf32>
    %33 = arith.truncf %30 : vector<8x128xf32> to vector<8x128xbf16>
    %cst_27 = arith.constant dense<0.000000e+00> : vector<8x128xf32>
    %34 = tpu.matmul %33, %31, %cst_27 {dimension_numbers = #tpu.dot_dimension_numbers<[1], [0], [0], [1], [0, 0, 1, 1], [], []>} : vector<8x128xbf16>, vector<128x128xbf16>, vector<8x128xf32> -> vector<8x128xf32>
    %35 = vector.broadcast %32 : vector<1x128xf32> to vector<8x128xf32>
    %36 = arith.addf %34, %35 : vector<8x128xf32>
    %cst_28 = arith.constant 0.000000e+00 : f32
    %37 = vector.broadcast %cst_28 : f32 to vector<8x128xf32>
    %38 = arith.maximumf %36, %37 : vector<8x128xf32>
    %c0_29 = arith.constant 0 : index
    %c0_30 = arith.constant 0 : index
    %39 = vector.load %arg12[%c0_29, %c0_30] : memref<128x64xbf16, #tpu.memory_space<vmem>>, vector<128x64xbf16>
    %c0_31 = arith.constant 0 : index
    %c0_32 = arith.constant 0 : index
    %40 = vector.load %arg13[%c0_31, %c0_32] : memref<1x64xf32, #tpu.memory_space<vmem>>, vector<1x64xf32>
    %41 = arith.truncf %38 : vector<8x128xf32> to vector<8x128xbf16>
    %cst_33 = arith.constant dense<0.000000e+00> : vector<8x64xf32>
    %42 = tpu.matmul %41, %39, %cst_33 {dimension_numbers = #tpu.dot_dimension_numbers<[1], [0], [0], [1], [0, 0, 1, 1], [], []>} : vector<8x128xbf16>, vector<128x64xbf16>, vector<8x64xf32> -> vector<8x64xf32>
    %43 = vector.broadcast %40 : vector<1x64xf32> to vector<8x64xf32>
    %44 = arith.addf %42, %43 : vector<8x64xf32>
    %cst_34 = arith.constant 0.000000e+00 : f32
    %45 = vector.broadcast %cst_34 : f32 to vector<8x64xf32>
    %46 = arith.maximumf %44, %45 : vector<8x64xf32>
    %c0_35 = arith.constant 0 : index
    %c0_36 = arith.constant 0 : index
    %47 = vector.load %arg14[%c0_35, %c0_36] : memref<64x128xbf16, #tpu.memory_space<vmem>>, vector<64x128xbf16>
    %c0_37 = arith.constant 0 : index
    %c0_38 = arith.constant 0 : index
    %48 = vector.load %arg15[%c0_37, %c0_38] : memref<1x128xf32, #tpu.memory_space<vmem>>, vector<1x128xf32>
    %49 = arith.truncf %46 : vector<8x64xf32> to vector<8x64xbf16>
    %cst_39 = arith.constant dense<0.000000e+00> : vector<8x128xf32>
    %50 = tpu.matmul %49, %47, %cst_39 {dimension_numbers = #tpu.dot_dimension_numbers<[1], [0], [0], [1], [0, 0, 1, 1], [], []>} : vector<8x64xbf16>, vector<64x128xbf16>, vector<8x128xf32> -> vector<8x128xf32>
    %51 = vector.broadcast %48 : vector<1x128xf32> to vector<8x128xf32>
    %52 = arith.addf %50, %51 : vector<8x128xf32>
    %cst_40 = arith.constant 0.000000e+00 : f32
    %53 = vector.broadcast %cst_40 : f32 to vector<8x128xf32>
    %54 = arith.maximumf %52, %53 : vector<8x128xf32>
    %c0_41 = arith.constant 0 : index
    %c0_42 = arith.constant 0 : index
    %55 = vector.load %arg16[%c0_41, %c0_42] : memref<128x784xbf16, #tpu.memory_space<vmem>>, vector<128x784xbf16>
    %c0_43 = arith.constant 0 : index
    %c0_44 = arith.constant 0 : index
    %56 = vector.load %arg17[%c0_43, %c0_44] : memref<1x784xf32, #tpu.memory_space<vmem>>, vector<1x784xf32>
    %57 = arith.truncf %54 : vector<8x128xf32> to vector<8x128xbf16>
    %cst_45 = arith.constant dense<0.000000e+00> : vector<8x784xf32>
    %58 = tpu.matmul %57, %55, %cst_45 {dimension_numbers = #tpu.dot_dimension_numbers<[1], [0], [0], [1], [0, 0, 1, 1], [], []>} : vector<8x128xbf16>, vector<128x784xbf16>, vector<8x784xf32> -> vector<8x784xf32>
    %59 = vector.broadcast %56 : vector<1x784xf32> to vector<8x784xf32>
    %60 = arith.addf %58, %59 : vector<8x784xf32>
    %61 = arith.negf %60 : vector<8x784xf32>
    %62 = math.exp %61 : vector<8x784xf32>
    %cst_46 = arith.constant 1.000000e+00 : f32
    %63 = vector.broadcast %cst_46 : f32 to vector<8x784xf32>
    %64 = arith.addf %63, %62 : vector<8x784xf32>
    %65 = arith.divf %63, %64 : vector<8x784xf32>
    %c0_47 = arith.constant 0 : index
    %c0_48 = arith.constant 0 : index
    %66 = vector.load %arg18[%c0_47, %c0_48] : memref<8x784xf32, #tpu.memory_space<vmem>>, vector<8x784xf32>
    tpu.vector_store %arg18[%c0_47, %c0_48], %65 {strides = array<i32>} : memref<8x784xf32, #tpu.memory_space<vmem>>, vector<8x784xf32>,
    return
  }
  func.func @transform_0(%arg0: i32) -> (i32, i32) {
    %c0_i32 = arith.constant 0 : i32
    %c0_i32_0 = arith.constant 0 : i32
    return %arg0, %c0_i32 : i32, i32
  }
  func.func @transform_1(%arg0: i32) -> (i32, i32) {
    %c0_i32 = arith.constant 0 : i32
    %c0_i32_0 = arith.constant 0 : i32
    %c0_i32_1 = arith.constant 0 : i32
    return %c0_i32, %c0_i32_0 : i32, i32
  }
  func.func @transform_2(%arg0: i32) -> (i32, i32) {
    %c0_i32 = arith.constant 0 : i32
    %c0_i32_0 = arith.constant 0 : i32
    %c0_i32_1 = arith.constant 0 : i32
    return %c0_i32, %c0_i32_0 : i32, i32
  }
  func.func @transform_3(%arg0: i32) -> (i32, i32) {
    %c0_i32 = arith.constant 0 : i32
    %c0_i32_0 = arith.constant 0 : i32
    %c0_i32_1 = arith.constant 0 : i32
    return %c0_i32, %c0_i32_0 : i32, i32
  }
  func.func @transform_4(%arg0: i32) -> (i32, i32) {
    %c0_i32 = arith.constant 0 : i32
    %c0_i32_0 = arith.constant 0 : i32
    %c0_i32_1 = arith.constant 0 : i32
    return %c0_i32, %c0_i32_0 : i32, i32
  }
  func.func @transform_5(%arg0: i32) -> (i32, i32) {
    %c0_i32 = arith.constant 0 : i32
    %c0_i32_0 = arith.constant 0 : i32
    %c0_i32_1 = arith.constant 0 : i32
    return %c0_i32, %c0_i32_0 : i32, i32
  }
  func.func @transform_6(%arg0: i32) -> (i32, i32) {
    %c0_i32 = arith.constant 0 : i32
    %c0_i32_0 = arith.constant 0 : i32
    %c0_i32_1 = arith.constant 0 : i32
    return %c0_i32, %c0_i32_0 : i32, i32
  }
  func.func @transform_7(%arg0: i32) -> (i32, i32) {
    %c0_i32 = arith.constant 0 : i32
    %c0_i32_0 = arith.constant 0 : i32
    %c0_i32_1 = arith.constant 0 : i32
    return %c0_i32, %c0_i32_0 : i32, i32
  }
  func.func @transform_8(%arg0: i32) -> (i32, i32) {
    %c0_i32 = arith.constant 0 : i32
    %c0_i32_0 = arith.constant 0 : i32
    %c0_i32_1 = arith.constant 0 : i32
    return %c0_i32, %c0_i32_0 : i32, i32
  }
  func.func @transform_9(%arg0: i32) -> (i32, i32) {
    %c0_i32 = arith.constant 0 : i32
    %c0_i32_0 = arith.constant 0 : i32
    %c0_i32_1 = arith.constant 0 : i32
    return %c0_i32, %c0_i32_0 : i32, i32
  }
  func.func @transform_10(%arg0: i32) -> (i32, i32) {
    %c0_i32 = arith.constant 0 : i32
    %c0_i32_0 = arith.constant 0 : i32
    %c0_i32_1 = arith.constant 0 : i32
    return %c0_i32, %c0_i32_0 : i32, i32
  }
  func.func @transform_11(%arg0: i32) -> (i32, i32) {
    %c0_i32 = arith.constant 0 : i32
    %c0_i32_0 = arith.constant 0 : i32
    %c0_i32_1 = arith.constant 0 : i32
    return %c0_i32, %c0_i32_0 : i32, i32
  }
  func.func @transform_12(%arg0: i32) -> (i32, i32) {
    %c0_i32 = arith.constant 0 : i32
    %c0_i32_0 = arith.constant 0 : i32
    %c0_i32_1 = arith.constant 0 : i32
    return %c0_i32, %c0_i32_0 : i32, i32
  }
  func.func @transform_13(%arg0: i32) -> (i32, i32) {
    %c0_i32 = arith.constant 0 : i32
    %c0_i32_0 = arith.constant 0 : i32
    %c0_i32_1 = arith.constant 0 : i32
    return %c0_i32, %c0_i32_0 : i32, i32
  }
  func.func @transform_14(%arg0: i32) -> (i32, i32) {
    %c0_i32 = arith.constant 0 : i32
    %c0_i32_0 = arith.constant 0 : i32
    %c0_i32_1 = arith.constant 0 : i32
    return %c0_i32, %c0_i32_0 : i32, i32
  }
  func.func @transform_15(%arg0: i32) -> (i32, i32) {
    %c0_i32 = arith.constant 0 : i32
    %c0_i32_0 = arith.constant 0 : i32
    %c0_i32_1 = arith.constant 0 : i32
    return %c0_i32, %c0_i32_0 : i32, i32
  }
  func.func @transform_16(%arg0: i32) -> (i32, i32) {
    %c0_i32 = arith.constant 0 : i32
    %c0_i32_0 = arith.constant 0 : i32
    %c0_i32_1 = arith.constant 0 : i32
    return %c0_i32, %c0_i32_0 : i32, i32
  }
  func.func @transform_17(%arg0: i32) -> (i32, i32) {
    %c0_i32 = arith.constant 0 : i32
    %c0_i32_0 = arith.constant 0 : i32
    return %arg0, %c0_i32 : i32, i32
  }
}

</mosaic_0001>

<bundles_post_ra>
// kernel: _forward_impl.1
= control target key start
LH: loop header
LB: loop body
LE: loop exit
PB: predicated region body
PF: predicated region fallthrough
CT: control target
= control target key end

     0   :  { %s3382_s0 = inlined_call_operand.vmem [shape: f32[2,784], index: 0, kind: input, shape index: {}]   ;;  %s3383_s1 = inlined_call_operand.vmem [shape: bf16[784,128], index: 1, kind: input, shape index: {}]   ;;  %s3384_s2 = inlined_call_operand.vmem [shape: f32[1,128], index: 2, kind: input, shape index: {}]   ;;  %s3385_s3 = inlined_call_operand.vmem [shape: bf16[128,64], index: 3, kind: input, shape index: {}]   ;;  %s3386_s4 = inlined_call_operand.vmem [shape: f32[1,64], index: 4, kind: input, shape index: {}]   ;;  %s3387_s5 = inlined_call_operand.vmem [shape: bf16[64,128], index: 5, kind: input, shape index: {}]   ;;  %s3388_s6 = inlined_call_operand.vmem [shape: f32[1,128], index: 6, kind: input, shape index: {}]   ;;  %s3389_s7 = inlined_call_operand.vmem [shape: bf16[128,128], index: 7, kind: input, shape index: {}]   ;;  %s3390_s8 = inlined_call_operand.vmem [shape: f32[1,128], index: 8, kind: input, shape index: {}]   ;;  %s3391_s9 = inlined_call_operand.vmem [shape: bf16[128,128], index: 9, kind: input, shape index: {}]   ;;  %s3392_s10 = inlined_call_operand.vmem [shape: f32[1,128], index: 10, kind: input, shape index: {}]   ;;  %s3393_s11 = inlined_call_operand.vmem [shape: bf16[128,64], index: 11, kind: input, shape index: {}]   ;;  %s3394_s12 = inlined_call_operand.vmem [shape: f32[1,64], index: 12, kind: input, shape index: {}]   ;;  %s3395_s13 = inlined_call_operand.vmem [shape: bf16[64,128], index: 13, kind: input, shape index: {}]   ;;  %s3396_s14 = inlined_call_operand.vmem [shape: f32[1,128], index: 14, kind: input, shape index: {}]   ;;  %s3397_s15 = inlined_call_operand.vmem [shape: bf16[128,784], index: 15, kind: input, shape index: {}]   ;;  %s3398_s16 = inlined_call_operand.vmem [shape: f32[1,784], index: 16, kind: input, shape index: {}]   ;;  %s3399_s17 = inlined_call_operand.hbm [shape: f32[2,784], index: 17, kind: output, shape index: {}]  }
   0x1   :  { %3402 = sst [smem:[#allocation5_spill]] %s3382_s0 }
   0x2   :  { %3403 = sst [smem:[#allocation6_spill]] %s3383_s1 }
   0x3   :  { %22 = vsyncpa [#allocation3], 0  ;;  %s3404_s26 = sld [smem:[#allocation6_spill]]  ;;  %vm506_vm0 = vcmask 130048   ;;  %vm722_vm1 = vcmask 523264  }
   0x4   :  { %s3405_s29 = sld [smem:[#allocation5_spill]] }
   0x9   :  { %v2313_v0 = vld [vmem:[%s3404_s26 + $0x38] sm:$0xff]  ;;  %v2312_v3 = vld [vmem:[%s3404_s26 + $0x30] sm:$0xff]  ;;  %v2311_v7 = vld [vmem:[%s3404_s26 + $0x28] sm:$0xff] }
   0xa   :  { %v2321_v1 = vld [vmem:[%s3404_s26 + $0x78] sm:$0xff]  ;;  %510 = vmatpush.bf16.msra.mxu0 %v2313_v0  ;;  %v2320_v4 = vld [vmem:[%s3404_s26 + $0x70] sm:$0xff]  ;;  %v2319_v8 = vld [vmem:[%s3404_s26 + $0x68] sm:$0xff] }
   0xb   :  { %v2329_v2 = vld [vmem:[%s3404_s26 + $0xb8] sm:$0xff]  ;;  %523 = vmatpush.bf16.msra.mxu1 %v2321_v1  ;;  %v2328_v5 = vld [vmem:[%s3404_s26 + $0xb0] sm:$0xff]  ;;  %v2327_v9 = vld [vmem:[%s3404_s26 + $0xa8] sm:$0xff] }
   0xc   :  { %536 = vmatpush.bf16.msra.mxu2 %v2329_v2  ;;  %v2337_v6 = vld [vmem:[%s3404_s26 + $0xf8] sm:$0xff]  ;;  %v2336_v10 = vld [vmem:[%s3404_s26 + $0xf0] sm:$0xff]  ;;  %v2310_v11 = vld [vmem:[%s3404_s26 + $0x20] sm:$0xff] }
   0xd   :  { %549 = vmatpush.bf16.msra.mxu3 %v2337_v6  ;;  %v2318_v12 = vld [vmem:[%s3404_s26 + $0x60] sm:$0xff]  ;;  %v2335_v14 = vld [vmem:[%s3404_s26 + $0xe8] sm:$0xff]  ;;  %v2309_v19 = vld [vmem:[%s3404_s26 + $0x18] sm:$0xff] }
   0xe   :  { %511 = vmatpush.bf16.msra.mxu0 %v2312_v3  ;;  %v2326_v13 = vld [vmem:[%s3404_s26 + $0xa0] sm:$0xff]  ;;  %v60_v16 = vld [vmem:[%s3405_s29 + $0xe] sm:$0xff]  ;;  %v2317_v20 = vld [vmem:[%s3404_s26 + $0x58] sm:$0xff] }
   0xf   :  { %524 = vmatpush.bf16.msra.mxu1 %v2320_v4  ;;  %v58_v15 = vld [vmem:[%s3405_s29] sm:$0xff]  ;;  %v64_v18 = vld [vmem:[%s3405_s29 + $0x2a] sm:$0xff]  ;;  %175 = vst [vmem:[#allocation1 + $0x1] ss:$4 sm:$0xff] %v60_v16  ;;  %v2325_v21 = vld [vmem:[%s3404_s26 + $0x98] sm:$0xff] }
  0x10   :  { %537 = vmatpush.bf16.msra.mxu2 %v2328_v5  ;;  %v62_v17 = vld [vmem:[%s3405_s29 + $0x1c] sm:$0xff]  ;;  %173 = vst [vmem:[#allocation1] ss:$4 sm:$0xff] %v58_v15  ;;  %v2308_v23 = vld [vmem:[%s3404_s26 + $0x10] sm:$0xff]  ;;  %v59_v24 = vld [vmem:[%s3405_s29 + $0x8] sm:$0x3f] }
  0x11   :  { %550 = vmatpush.bf16.msra.mxu3 %v2336_v10  ;;  %177 = vst [vmem:[#allocation1 + $0x2] ss:$4 sm:$0xff] %v62_v17  ;;  %v2334_v22 = vld [vmem:[%s3404_s26 + $0xe0] sm:$0xff]  ;;  %v61_v25 = vld [vmem:[%s3405_s29 + $0x16] sm:$0x3f]  ;;  %v2307_v31 = vld [vmem:[%s3404_s26 + $0x8] sm:$0xff] }
  0x12   :  { %512 = vmatpush.bf16.msra.mxu0 %v2311_v7  ;;  %179 = vst [vmem:[#allocation1 + $0x3] ss:$4 sm:$0xff] %v64_v18  ;;  %v2316_v26 = vld [vmem:[%s3404_s26 + $0x50] sm:$0xff]  ;;  %v63_v27 = vld [vmem:[%s3405_s29 + $0x24] sm:$0x3f]  ;;  %v2333_v30 = vld [vmem:[%s3404_s26 + $0xd8] sm:$0xff] }
  0x13   :  { %525 = vmatpush.bf16.msra.mxu1 %v2319_v8  ;;  %v65_v28 = vld [vmem:[%s3405_s29 + $0x32] sm:$0x3f]  ;;  %181 = vst [vmem:[#allocation1 + $0x20] ss:$4 sm:$0xff] %v59_v24  ;;  %v2315_v32 = vld [vmem:[%s3404_s26 + $0x48] sm:$0xff]  ;;  %v2306_v35 = vld [vmem:[%s3404_s26] sm:$0xff] }
  0x14   :  { %538 = vmatpush.bf16.msra.mxu2 %v2327_v9  ;;  %v2324_v29 = vld [vmem:[%s3404_s26 + $0x90] sm:$0xff]  ;;  %183 = vst [vmem:[#allocation1 + $0x21] ss:$4 sm:$0xff] %v61_v25  ;;  %v2323_v33 = vld [vmem:[%s3404_s26 + $0x88] sm:$0xff]  ;;  %v2314_v36 = vld [vmem:[%s3404_s26 + $0x40] sm:$0xff] }
  0x15   :  { %551 = vmatpush.bf16.msra.mxu3 %v2335_v14  ;;  %185 = vst [vmem:[#allocation1 + $0x22] ss:$4 sm:$0xff] %v63_v27  ;;  %v2332_v34 = vld [vmem:[%s3404_s26 + $0xd0] sm:$0xff]  ;;  %v2345_v39 = vld [vmem:[%s3404_s26 + $0x138] sm:$0xff]  ;;  %v2322_v41 = vld [vmem:[%s3404_s26 + $0x80] sm:$0xff] }
  0x16   :  { %513 = vmatpush.bf16.msra.mxu0 %v2310_v11  ;;  %187 = vst [vmem:[#allocation1 + $0x23] ss:$4 sm:$0xff] %v65_v28  ;;  %v2353_v40 = vld [vmem:[%s3404_s26 + $0x178] sm:$0xff]  ;;  %v2331_v42 = vld [vmem:[%s3404_s26 + $0xc8] sm:$0xff]  ;;  %v2354_v46 = vld [vmem:[%s3404_s26 + $0x180] sm:$0xff] }
  0x17   :  { %526 = vmatpush.bf16.msra.mxu1 %v2318_v12  ;;  %v2344_v47 = vld [vmem:[%s3404_s26 + $0x130] sm:$0xff]  ;;  %v2330_v50 = vld [vmem:[%s3404_s26 + $0xc0] sm:$0xff]  ;;  %v2343_v52 = vld [vmem:[%s3404_s26 + $0x128] sm:$0xff] }
  0x18   :  { %539 = vmatpush.bf16.msra.mxu2 %v2326_v13  ;;  %v2352_v48 = vld [vmem:[%s3404_s26 + $0x170] sm:$0xff]  ;;  %v2351_v53 = vld [vmem:[%s3404_s26 + $0x168] sm:$0xff]  ;;  %v2342_v55 = vld [vmem:[%s3404_s26 + $0x120] sm:$0xff] }
  0x19   :  { %552 = vmatpush.bf16.msra.mxu3 %v2334_v22  ;;  %v188_v37 = vld.sshfl [vmem:[#allocation1] sm:$0xff pattern:$0x73625140]  ;;  %v189_v38 = vld.sshfl [vmem:[#allocation1 + $0x8] sm:$0xff pattern:$0x73625140] }
  0x1a   :  { %514 = vmatpush.bf16.msra.mxu0 %v2309_v19  ;;  %v190_v43 = vld.sshfl [vmem:[#allocation1 + $0x10] sm:$0xff pattern:$0x73625140]  ;;  %v202_v44 = vpack.c.bf16 %v188_v37, %v188_v37  ;;  %v203_v45 = vpack.c.bf16 %v189_v38, %v189_v38  ;;  %v191_v51 = vld.sshfl [vmem:[#allocation1 + $0x18] sm:$0xff pattern:$0x73625140] }
  0x1b   :  { %527 = vmatpush.bf16.msra.mxu1 %v2317_v20  ;;  %v204_v49 = vpack.c.bf16 %v190_v43, %v190_v43  ;;  %v205_v54 = vpack.c.bf16 %v191_v51, %v191_v51  ;;  %v2350_v56 = vld [vmem:[%s3404_s26 + $0x160] sm:$0xff]  ;;  %v2341_v57 = vld [vmem:[%s3404_s26 + $0x118] sm:$0xff]  ;;  %v2340_v60 = vld [vmem:[%s3404_s26 + $0x110] sm:$0xff] }
  0x1c   :  { %540 = vmatpush.bf16.msra.mxu2 %v2325_v21  ;;  %v2349_v58 = vld [vmem:[%s3404_s26 + $0x158] sm:$0xff]  ;;  %v2348_v61 = vld [vmem:[%s3404_s26 + $0x150] sm:$0xff]  ;;  %v2339_v63 = vld [vmem:[%s3404_s26 + $0x108] sm:$0xff] }
  0x1d   :  { %553 = vmatpush.bf16.msra.mxu3 %v2333_v30  ;;  %v194_v59 = vld.sshfl [vmem:[#allocation1 + $0x30] sm:$0xff pattern:$0x73625140]  ;;  %v2347_v0 = vld [vmem:[%s3404_s26 + $0x148] sm:$0xff]  ;;  %v2338_v1 = vld [vmem:[%s3404_s26 + $0x100] sm:$0xff] }
  0x1e   :  { %515 = vmatpush.bf16.msra.mxu0 %v2308_v23  ;;  %v208_v62 = vpack.c.bf16 %v194_v59, %v194_v59  ;;  %v2346_v2 = vld [vmem:[%s3404_s26 + $0x140] sm:$0xff]  ;;  %v193_v4 = vld.sshfl [vmem:[#allocation1 + $0x28] sm:$0xff pattern:$0x73625140]  ;;  %v2362_v7 = vld [vmem:[%s3385_s3 + $0x38] sm:$0xff] }
  0x1f   :  { %528 = vmatpush.bf16.msra.mxu1 %v2316_v26  ;;  %v192_v3 = vld.sshfl [vmem:[#allocation1 + $0x20] sm:$0xff pattern:$0x73625140]  ;;  %v207_v6 = vpack.c.bf16 %v193_v4, %v193_v4  ;;  %v2361_v8 = vld [vmem:[%s3385_s3 + $0x30] sm:$0xff]  ;;  %v2360_v9 = vld [vmem:[%s3385_s3 + $0x28] sm:$0xff] }
  0x20   :  { %541 = vmatpush.bf16.msra.mxu2 %v2324_v29  ;;  %v206_v5 = vpack.c.bf16 %v192_v3, %v192_v3  ;;  %v2359_v10 = vld [vmem:[%s3385_s3 + $0x20] sm:$0xff]  ;;  %v2358_v11 = vld [vmem:[%s3385_s3 + $0x18] sm:$0xff]  ;;  %v2357_v12 = vld [vmem:[%s3385_s3 + $0x10] sm:$0xff] }
  0x21   :  { %554 = vmatpush.bf16.msra.mxu3 %v2332_v34  ;;  %v2356_v13 = vld [vmem:[%s3385_s3 + $0x8] sm:$0xff]  ;;  %v2355_v16 = vld [vmem:[%s3385_s3] sm:$0xff]  ;;  %v2366_v19 = vld [vmem:[%s3387_s5 + $0x18] sm:$0xff] }
  0x22   :  { %516 = vmatpush.bf16.msra.mxu0 %v2307_v31  ;;  %v2365_v21 = vld [vmem:[%s3387_s5 + $0x10] sm:$0xff]  ;;  %v2454_v22 = vld [vmem:[%s3384_s2] ss:$0 sm:$0xff]  ;;  %v2364_v24 = vld [vmem:[%s3387_s5 + $0x8] sm:$0xff] }
  0x23   :  { %529 = vmatpush.bf16.msra.mxu1 %v2315_v32  ;;  %v2374_v43 = vld [vmem:[%s3389_s7 + $0x38] sm:$0xff]  ;;  %v2380_v59 = vld [vmem:[%s3391_s9 + $0x28] sm:$0xff] }
  0x24   :  { %542 = vmatpush.bf16.msra.mxu2 %v2323_v33 }
  0x25   :  { %555 = vmatpush.bf16.msra.mxu3 %v2331_v42  ;;  %v2363_v42 = vld [vmem:[%s3387_s5] sm:$0xff] }
  0x26   :  { %517 = vmatpush.bf16.msra.mxu0 %v2306_v35 }
  0x27   :  { %530 = vmatpush.bf16.msra.mxu1 %v2314_v36 }
  0x28   :  { %543 = vmatpush.bf16.msra.mxu2 %v2322_v41 }
  0x29   :  { %518 = vmatmul.bf16.vlgmr.msra.gmra.mxu0 %v202_v44  ;;  %556 = vmatpush.bf16.msra.mxu3 %v2330_v50  ;;  %v2373_v44 = vld [vmem:[%s3389_s7 + $0x30] sm:$0xff] }
  0x2a   :  { %562 = vmatpush.bf16.msrb.mxu0 %v2345_v39  ;;  %531 = vmatmul.bf16.vlgmr.msra.gmra.mxu1 %v203_v45  ;;  %v2372_v45 = vld [vmem:[%s3389_s7 + $0x28] sm:$0xff] }
  0x2b   :  { %575 = vmatpush.bf16.msrb.mxu1 %v2353_v40  ;;  %544 = vmatmul.bf16.vlgmr.msra.gmra.mxu2 %v204_v49  ;;  %v2455_v49 = vld [vmem:[%s3386_s4] ss:$0 sm:$0xff] }
  0x2c   :  { %595 = vmatpush.bf16.msrb.mxu2 %v2354_v46  ;;  %557 = vmatmul.bf16.vlgmr.msra.gmra.mxu3 %v205_v54  ;;  %v2371_v46 = vld [vmem:[%s3389_s7 + $0x20] sm:$0xff] }
  0x2d   :  { %671 = vmatpush.bf16.msrb.mxu3 %v2362_v7  ;;  %v2390_v7 = vld [vmem:[%s3393_s11 + $0x38] sm:$0xff] }
  0x2e   :  { %563 = vmatpush.bf16.msrb.mxu0 %v2344_v47  ;;  %v2370_v47 = vld [vmem:[%s3389_s7 + $0x18] sm:$0xff] }
  0x2f   :  { %576 = vmatpush.bf16.msrb.mxu1 %v2352_v48  ;;  %v2369_v48 = vld [vmem:[%s3389_s7 + $0x10] sm:$0xff] }
  0x30   :  { %730 = vmatpush.bf16.msra.mxu2 %v2366_v19  ;;  %v2383_v19 = vld [vmem:[%s3393_s11] sm:$0xff] }
  0x31   :  { %672 = vmatpush.bf16.msrb.mxu3 %v2361_v8  ;;  %v2389_v8 = vld [vmem:[%s3393_s11 + $0x30] sm:$0xff] }
  0x32   :  { %564 = vmatpush.bf16.msrb.mxu0 %v2343_v52 }
  0x33   :  { %577 = vmatpush.bf16.msrb.mxu1 %v2351_v53 }
  0x34   :  { %731 = vmatpush.bf16.msra.mxu2 %v2365_v21  ;;  %v2393_v21 = vld [vmem:[%s3395_s13 + $0x10] sm:$0xff] }
  0x35   :  { %673 = vmatpush.bf16.msrb.mxu3 %v2360_v9  ;;  %v2388_v9 = vld [vmem:[%s3393_s11 + $0x28] sm:$0xff] }
  0x36   :  { %565 = vmatpush.bf16.msrb.mxu0 %v2342_v55  ;;  %v2368_v55 = vld [vmem:[%s3389_s7 + $0x8] sm:$0xff] }
  0x37   :  { %578 = vmatpush.bf16.msrb.mxu1 %v2350_v56  ;;  %v2367_v56 = vld [vmem:[%s3389_s7] sm:$0xff] }
  0x38   :  { %732 = vmatpush.bf16.msra.mxu2 %v2364_v24 }
  0x39   :  { %674 = vmatpush.bf16.msrb.mxu3 %v2359_v10  ;;  %v2387_v10 = vld [vmem:[%s3393_s11 + $0x20] sm:$0xff] }
  0x3a   :  { %566 = vmatpush.bf16.msrb.mxu0 %v2341_v57  ;;  %v2382_v57 = vld [vmem:[%s3391_s9 + $0x38] sm:$0xff] }
  0x3b   :  { %579 = vmatpush.bf16.msrb.mxu1 %v2349_v58  ;;  %1912 = vmatmul.msk.bf16.vlgmr.msrb.gmra.mxu2 %vm506_vm0, %v208_v62  ;;  %v2381_v58 = vld [vmem:[%s3391_s9 + $0x30] sm:$0xff] }
  0x3c   :  { %733 = vmatpush.bf16.msra.mxu2 %v2363_v42  ;;  %v2377_v62 = vld [vmem:[%s3391_s9 + $0x10] sm:$0xff] }
  0x3d   :  { %675 = vmatpush.bf16.msrb.mxu3 %v2358_v11  ;;  %v2386_v11 = vld [vmem:[%s3393_s11 + $0x18] sm:$0xff] }
  0x3e   :  { %567 = vmatpush.bf16.msrb.mxu0 %v2340_v60  ;;  %v2379_v60 = vld [vmem:[%s3391_s9 + $0x20] sm:$0xff] }
  0x3f   :  { %580 = vmatpush.bf16.msrb.mxu1 %v2348_v61  ;;  %v2378_v61 = vld [vmem:[%s3391_s9 + $0x18] sm:$0xff] }
  0x40   :  { %974 = vmatpush.bf16.msrb.mxu2 %v2390_v7 }
  0x41   :  { %676 = vmatpush.bf16.msrb.mxu3 %v2357_v12  ;;  %v2385_v12 = vld [vmem:[%s3393_s11 + $0x10] sm:$0xff] }
  0x42   :  { %568 = vmatpush.bf16.msrb.mxu0 %v2339_v63  ;;  %v2456_v63 = vld [vmem:[%s3388_s6] ss:$0 sm:$0xff] }
  0x43   :  { %581 = vmatpush.bf16.msrb.mxu1 %v2347_v0  ;;  %v2376_v0 = vld [vmem:[%s3391_s9 + $0x8] sm:$0xff] }
  0x44   :  { %975 = vmatpush.bf16.msrb.mxu2 %v2389_v8 }
  0x45   :  { %677 = vmatpush.bf16.msrb.mxu3 %v2356_v13  ;;  %v2457_v13 = vld [vmem:[%s3390_s8] ss:$0 sm:$0xff] }
  0x46   :  { %569 = vmatpush.bf16.msrb.mxu0 %v2338_v1 }
  0x47   :  { %582 = vmatpush.bf16.msrb.mxu1 %v2346_v2 }
  0x48   :  { %976 = vmatpush.bf16.msrb.mxu2 %v2388_v9  ;;  %v2416_v9 = vld [vmem:[%s3397_s15 + $0xac] sm:$0xf] }
  0x49   :  { %570 = vmatmul.bf16.vlgmr.msrb.gmra.mxu0 %v206_v5  ;;  %678 = vmatpush.bf16.msrb.mxu3 %v2355_v16 }
  0x4a   :  { %583 = vmatmul.bf16.vlgmr.msrb.gmra.mxu1 %v207_v6  ;;  %809 = vmatpush.bf16.msra.mxu0 %v2374_v43  ;;  %v2375_v6 = vld [vmem:[%s3391_s9] sm:$0xff]  ;;  %v2247_v43 = vld [vmem:[%s3397_s15 + $0x16c] sm:$0xf0] }
  0x4b   :  { %891 = vmatpush.bf16.msra.mxu1 %v2382_v57 }
  0x4c   :  { %977 = vmatpush.bf16.msrb.mxu2 %v2387_v10  ;;  %v2163_v10 = vld [vmem:[%s3397_s15 + $0xc4] sm:$0xf0] }
  0x4e   :  { %810 = vmatpush.bf16.msra.mxu0 %v2373_v44  ;;  %v2253_v44 = vld [vmem:[%s3397_s15 + $0x158] sm:$0xf] }
  0x4f   :  { %892 = vmatpush.bf16.msra.mxu1 %v2381_v58 }
  0x50   :  { %978 = vmatpush.bf16.msrb.mxu2 %v2386_v11  ;;  %v2169_v11 = vld [vmem:[%s3397_s15 + $0xb0] sm:$0xf] }
  0x52   :  { %811 = vmatpush.bf16.msra.mxu0 %v2372_v45  ;;  %v2441_v45 = vld [vmem:[%s3397_s15 + $0x170] sm:$0xf0] }
  0x53   :  { %893 = vmatpush.bf16.msra.mxu1 %v2380_v59  ;;  %v2423_v59 = vld [vmem:[%s3397_s15 + $0xe4] sm:$0xf] }
  0x54   :  { %979 = vmatpush.bf16.msrb.mxu2 %v2385_v12 }
  0x56   :  { %812 = vmatpush.bf16.msra.mxu0 %v2371_v46 }
  0x57   :  { %894 = vmatpush.bf16.msra.mxu1 %v2379_v60  ;;  %v2445_v60 = vld [vmem:[%s3397_s15 + $0x194] sm:$0xf] }
  0x5a   :  { %813 = vmatpush.bf16.msra.mxu0 %v2370_v47  ;;  %v2254_v47 = vor.u32 %v2441_v45, %v2253_v44  ;;  %v2395_v44 = vld [vmem:[%s3397_s15 + $0x4] sm:$0xf] }
  0x5b   :  { %895 = vmatpush.bf16.msra.mxu1 %v2378_v61  ;;  %v2283_v61 = vld [vmem:[%s3397_s15 + $0x1ac] sm:$0xf0] }
  0x5e   :  { %814 = vmatpush.bf16.msra.mxu0 %v2369_v48  ;;  %v2217_v48 = vld [vmem:[%s3397_s15 + $0x118] sm:$0xf] }
  0x5f   :  { %896 = vmatpush.bf16.msra.mxu1 %v2377_v62  ;;  %v2191_v62 = vld [vmem:[%s3397_s15 + $0xfc] sm:$0xf0] }
  0x60   :  { %v2194_v7 = vor.u32 %v2423_v59, %v2191_v62 }
  0x62   :  { %815 = vmatpush.bf16.msra.mxu0 %v2368_v55  ;;  %v2189_v55 = vld [vmem:[%s3397_s15 + $0xe0] sm:$0xf] }
  0x63   :  { %897 = vmatpush.bf16.msra.mxu1 %v2376_v0  ;;  %v2427_v0 = vld [vmem:[%s3397_s15 + $0x100] sm:$0xf0] }
  0x66   :  { %816 = vmatpush.bf16.msra.mxu0 %v2367_v56  ;;  %v2426_v56 = vld [vmem:[%s3397_s15 + $0xf8] sm:$0xf0] }
  0x67   :  { %898 = vmatpush.bf16.msra.mxu1 %v2375_v6  ;;  %v2255_v6 = vld [vmem:[%s3397_s15 + $0x174] sm:$0xf0] }
  0xa6   :  { %v519_v14 = vpop.f32.mrf.mxu0 }
  0xa7   :  { %v532_v15 = vpop.f32.mrf.mxu1  ;;  %v520_v25 = vadd.f32 %v2454_v22, %v519_v14  ;;  %v2392_v22 = vld [vmem:[%s3395_s13 + $0x8] sm:$0xff] }
  0xa9   :  { %v533_v27 = vadd.f32 %v532_v15, %v520_v25 }
  0xae   :  { %v521_v17 = vpop.f32.mrf.mxu0  ;;  %v545_v20 = vpop.f32.mrf.mxu2 }
  0xaf   :  { %v534_v18 = vpop.f32.mrf.mxu1  ;;  %v558_v23 = vpop.f32.mrf.mxu3  ;;  %v546_v29 = vadd.f32 %v545_v20, %v533_v27  ;;  %v2394_v20 = vld [vmem:[%s3395_s13 + $0x18] sm:$0xff] }
  0xb0   :  { %v2384_v18 = vld [vmem:[%s3393_s11 + $0x8] sm:$0xff]  ;;  %1032 = vmatpush.bf16.msra.mxu3 %v2394_v20  ;;  %v2166_v20 = vor.u32 %v2416_v9, %v2163_v10  ;;  %v2263_v9 = vld [vmem:[%s3397_s15 + $0x17c] sm:$0xf0] }
  0xb1   :  { %v559_v31 = vadd.f32 %v558_v23, %v546_v29  ;;  %980 = vmatpush.bf16.msrb.mxu2 %v2384_v18  ;;  %v2458_v23 = vld [vmem:[%s3392_s10] ss:$0 sm:$0xff]  ;;  %v2412_v18 = vld [vmem:[%s3397_s15 + $0x88] sm:$0xf0]  ;;  %v2269_v10 = vld [vmem:[%s3397_s15 + $0x168] sm:$0xf] }
  0xb2   :  { %v2391_v29 = vld [vmem:[%s3395_s13] sm:$0xff] }
  0xb4   :  { %1033 = vmatpush.bf16.msra.mxu3 %v2393_v21 }
  0xb5   :  { %981 = vmatpush.bf16.msrb.mxu2 %v2383_v19 }
  0xb6   :  { %v547_v26 = vpop.f32.mrf.mxu2 }
  0xb7   :  { %v560_v28 = vpop.f32.mrf.mxu3 }
  0xb8   :  { %1034 = vmatpush.bf16.msra.mxu3 %v2392_v22  ;;  %v2409_v22 = vld [vmem:[%s3397_s15 + $0x74] sm:$0xf] }
  0xbc   :  { %1035 = vmatpush.bf16.msra.mxu3 %v2391_v29 }
  0xbe   :  { %v597_v30 = vpop.f32.mrf.mxu2 }
  0xc6   :  { %v571_v32 = vpop.f32.mrf.mxu0  ;;  %v599_v36 = vpop.f32.mrf.mxu2 }
  0xc7   :  { %v584_v33 = vpop.f32.mrf.mxu1  ;;  %v572_v34 = vadd.f32 %v571_v32, %v559_v31  ;;  %v2447_v31 = vld [vmem:[%s3397_s15 + $0x1a0] sm:$0xf0]  ;;  %v2444_v32 = vld [vmem:[%s3397_s15 + $0x18c] sm:$0xf] }
  0xc8   :  { %v2448_v36 = vld [vmem:[%s3397_s15 + $0x1a8] sm:$0xf0] }
  0xc9   :  { %v585_v35 = vadd.f32 %v584_v33, %v572_v34  ;;  %v2275_v34 = vld [vmem:[%s3397_s15 + $0x1a4] sm:$0xf0] }
  0xcb   :  { %v598_v37 = vadd.f32 %v597_v30, %v585_v35  ;;  %v2273_v30 = vld [vmem:[%s3397_s15 + $0x188] sm:$0xf]  ;;  %v2281_v35 = vld [vmem:[%s3397_s15 + $0x190] sm:$0xf] }
  0xcc   :  { %v2274_v33 = vor.u32 %v2447_v31, %v2273_v30  ;;  %v2105_v30 = vld [vmem:[%s3397_s15 + $0x38] sm:$0xf]  ;;  %v2405_v31 = vld [vmem:[%s3397_s15 + $0x50] sm:$0xf0] }
  0xcd   :  { %v601_v38 = vmax.f32 %v598_v37, 0.0  ;;  %v2278_v37 = vor.u32 %v2444_v32, %v2275_v34 }
  0xce   :  { %v573_v39 = vpop.f32.mrf.mxu0 }
  0xcf   :  { %v586_v40 = vpop.f32.mrf.mxu1  ;;  %v619_v41 = vpack.c.bf16 %v601_v38, %v601_v38  ;;  %v2282_v38 = vor.u32 %v2448_v36, %v2281_v35  ;;  %v2245_v39 = vld [vmem:[%s3397_s15 + $0x150] sm:$0xf]  ;;  %1424 = vmatpush.bf16.msrb.mxu0 %v2278_v37  ;;  %v2402_v35 = vld [vmem:[%s3397_s15 + $0x3c] sm:$0xf]  ;;  %v2417_v36 = vld [vmem:[%s3397_s15 + $0xb4] sm:$0xf] }
  0xd0   :  { %v2440_v40 = vld [vmem:[%s3397_s15 + $0x168] sm:$0xf0]  ;;  %v2171_v37 = vld [vmem:[%s3397_s15 + $0xcc] sm:$0xf0] }
  0xd1   :  { %679 = vmatmul.bf16.vlgmr.msrb.gmra.mxu3 %v619_v41  ;;  %v2437_v41 = vld [vmem:[%s3397_s15 + $0x154] sm:$0xf]  ;;  %v2246_v42 = vor.u32 %v2440_v40, %v2245_v39  ;;  %1437 = vmatpush.bf16.msrb.mxu1 %v2282_v38  ;;  %v2107_v38 = vld [vmem:[%s3397_s15 + $0x54] sm:$0xf0]  ;;  %v2113_v39 = vld [vmem:[%s3397_s15 + $0x40] sm:$0xf]  ;;  %v2174_v45 = vor.u32 %v2417_v36, %v2171_v37 }
  0xd2   :  { %1411 = vmatpush.bf16.msrb.mxu3 %v2274_v33  ;;  %v2250_v46 = vor.u32 %v2437_v41, %v2247_v43  ;;  %v2406_v40 = vld [vmem:[%s3397_s15 + $0x58] sm:$0xf0]  ;;  %v2106_v41 = vor.u32 %v2405_v31, %v2105_v30  ;;  %v2205_v30 = vld [vmem:[%s3397_s15 + $0xf0] sm:$0xf]  ;;  %v2213_v37 = vld [vmem:[%s3397_s15 + $0xf8] sm:$0xf] }
  0xd3   :  { %v2398_v43 = vld [vmem:[%s3397_s15 + $0x18] sm:$0xf0] }
  0xd4   :  { %1425 = vmatpush.bf16.msrb.mxu0 %v2250_v46 }
  0xd5   :  { %1438 = vmatpush.bf16.msrb.mxu1 %v2254_v47  ;;  %v2110_v47 = vor.u32 %v2402_v35, %v2107_v38  ;;  %v2429_v38 = vld [vmem:[%s3397_s15 + $0x110] sm:$0xf0] }
  0xd6   :  { %1412 = vmatpush.bf16.msrb.mxu3 %v2246_v42  ;;  %v2077_v42 = vld [vmem:[%s3397_s15] sm:$0xf] }
 0x154   :  { %v680_v50 = vpop.f32.mrf.mxu3 }
 0x155   :  { %v681_v51 = vadd.f32 %v2455_v49, %v680_v50  ;;  %v2433_v49 = vld [vmem:[%s3397_s15 + $0x130] sm:$0xf0]  ;;  %v2430_v50 = vld [vmem:[%s3397_s15 + $0x11c] sm:$0xf] }
 0x157   :  { %v684_v52 = vmax.f32 %v681_v51, 0.0  ;;  %v2219_v51 = vld [vmem:[%s3397_s15 + $0x134] sm:$0xf0] }
 0x158   :  { %v2222_v57 = vor.u32 %v2430_v50, %v2219_v51  ;;  %v2410_v50 = vld [vmem:[%s3397_s15 + $0x7c] sm:$0xf]  ;;  %v2143_v51 = vld [vmem:[%s3397_s15 + $0x94] sm:$0xf0] }
 0x159   :  { %v694_v53 = vpack.c.bf16 %v684_v52, %v684_v52  ;;  %v2225_v52 = vld [vmem:[%s3397_s15 + $0x120] sm:$0xf]  ;;  %v2146_v62 = vor.u32 %v2410_v50, %v2143_v51  ;;  %v2414_v50 = vld [vmem:[%s3397_s15 + $0x98] sm:$0xf0]  ;;  %v2411_v51 = vld [vmem:[%s3397_s15 + $0x84] sm:$0xf] }
 0x15a   :  { %1426 = vmatpush.bf16.msrb.mxu0 %v2222_v57  ;;  %v2446_v57 = vld [vmem:[%s3397_s15 + $0x19c] sm:$0xf] }
 0x15b   :  { %1961 = vmatmul.msk.bf16.vlgmr.msra.gmra.mxu2 %vm722_vm1, %v694_v53  ;;  %v2434_v53 = vld [vmem:[%s3397_s15 + $0x138] sm:$0xf0] }
 0x15c   :  { %v682_v54 = vpop.f32.mrf.mxu3  ;;  %v2226_v58 = vor.u32 %v2434_v53, %v2225_v52  ;;  %v2085_v53 = vld [vmem:[%s3397_s15 + $0x8] sm:$0xf] }
 0x15d   :  { %v2218_v54 = vor.u32 %v2433_v49, %v2217_v48  ;;  %v2114_v48 = vor.u32 %v2406_v40, %v2113_v39  ;;  %v2079_v49 = vld [vmem:[%s3397_s15 + $0x1c] sm:$0xf0]  ;;  %v2214_v39 = vor.u32 %v2429_v38, %v2213_v37  ;;  %v2177_v40 = vld [vmem:[%s3397_s15 + $0xb8] sm:$0xf] }
 0x15e   :  { %1439 = vmatpush.bf16.msrb.mxu1 %v2226_v58  ;;  %1427 = vmatpush.bf16.msrb.mxu0 %v2194_v7  ;;  %v2291_v58 = vld [vmem:[%s3397_s15 + $0x1b4] sm:$0xf0]  ;;  %v2442_v7 = vld [vmem:[%s3397_s15 + $0x178] sm:$0xf0] }
 0x15f   :  { %1413 = vmatpush.bf16.msrb.mxu3 %v2218_v54  ;;  %v2399_v54 = vld [vmem:[%s3397_s15 + $0x20] sm:$0xf0] }
 0x162   :  { %1428 = vmatpush.bf16.msrb.mxu0 %v2166_v20  ;;  %v2435_v20 = vld [vmem:[%s3397_s15 + $0x140] sm:$0xf0] }
 0x1de   :  { %v735_v1 = vpop.f32.mrf.mxu2 }
 0x1df   :  { %v736_v2 = vadd.f32 %v2456_v63, %v735_v1  ;;  %v2197_v63 = vld [vmem:[%s3397_s15 + $0xe8] sm:$0xf]  ;;  %v2286_v1 = vor.u32 %v2445_v60, %v2283_v61  ;;  %v2297_v60 = vld [vmem:[%s3397_s15 + $0x1a0] sm:$0xf]  ;;  %v2450_v61 = vld [vmem:[%s3397_s15 + $0x1b8] sm:$0xf0] }
 0x1e0   :  { %v2198_v8 = vor.u32 %v2427_v0, %v2197_v63  ;;  %v2078_v63 = vor.u32 %v2398_v43, %v2077_v42  ;;  %v2082_v0 = vor.u32 %v2395_v44, %v2079_v49  ;;  %v2418_v42 = vld [vmem:[%s3397_s15 + $0xbc] sm:$0xf]  ;;  %v2179_v44 = vld [vmem:[%s3397_s15 + $0xd4] sm:$0xf0]  ;;  %v2149_v49 = vld [vmem:[%s3397_s15 + $0x80] sm:$0xf] }
 0x1e1   :  { %v739_v3 = vmax.f32 %v736_v2, 0.0  ;;  %v2438_v2 = vld [vmem:[%s3397_s15 + $0x15c] sm:$0xf]  ;;  %1450 = vmatpush.bf16.msra.mxu2 %v2286_v1 }
 0x1e2   :  { %v2258_v12 = vor.u32 %v2438_v2, %v2255_v6  ;;  %1440 = vmatpush.bf16.msrb.mxu1 %v2198_v8  ;;  %v2086_v2 = vor.u32 %v2399_v54, %v2085_v53  ;;  %v2261_v6 = vld [vmem:[%s3397_s15 + $0x160] sm:$0xf]  ;;  %v2439_v8 = vld [vmem:[%s3397_s15 + $0x164] sm:$0xf]  ;;  %v2157_v54 = vld [vmem:[%s3397_s15 + $0x88] sm:$0xf] }
 0x1e3   :  { %v757_v4 = vpack.c.bf16 %v739_v3, %v739_v3  ;;  %v2190_v3 = vor.u32 %v2426_v56, %v2189_v55  ;;  %v2289_v55 = vld [vmem:[%s3397_s15 + $0x198] sm:$0xf]  ;;  %v2449_v56 = vld [vmem:[%s3397_s15 + $0x1b0] sm:$0xf0]  ;;  %v2151_v53 = vld [vmem:[%s3397_s15 + $0x9c] sm:$0xf0] }
 0x1e5   :  { %817 = vmatmul.bf16.vlgmr.msra.gmra.mxu0 %v757_v4  ;;  %v2161_v4 = vld [vmem:[%s3397_s15 + $0xa8] sm:$0xf]  ;;  %1414 = vmatpush.bf16.msrb.mxu3 %v2190_v3  ;;  %v2290_v3 = vor.u32 %v2449_v56, %v2289_v55  ;;  %v2415_v55 = vld [vmem:[%s3397_s15 + $0xa0] sm:$0xf0]  ;;  %v2154_v56 = vor.u32 %v2411_v51, %v2151_v53 }
 0x1e6   :  { %v737_v5 = vpop.f32.mrf.mxu2  ;;  %1451 = vmatpush.bf16.msra.mxu2 %v2258_v12 }
 0x1e7   :  { %v2419_v5 = vld [vmem:[%s3397_s15 + $0xc0] sm:$0xf0] }
 0x262   :  { %v818_v14 = vpop.f32.mrf.mxu0 }
 0x263   :  { %v819_v15 = vadd.f32 %v2457_v13, %v818_v14  ;;  %v2420_v13 = vld [vmem:[%s3397_s15 + $0xc8] sm:$0xf0]  ;;  %v2431_v14 = vld [vmem:[%s3397_s15 + $0x124] sm:$0xf] }
 0x264   :  { %v2170_v21 = vor.u32 %v2420_v13, %v2169_v11  ;;  %v2443_v11 = vld [vmem:[%s3397_s15 + $0x180] sm:$0xf0]  ;;  %v2262_v13 = vor.u32 %v2442_v7, %v2261_v6  ;;  %v2095_v6 = vld [vmem:[%s3397_s15 + $0x2c] sm:$0xf0]  ;;  %v2101_v7 = vld [vmem:[%s3397_s15 + $0x18] sm:$0xf] }
 0x265   :  { %v839_v16 = vpack.c.bf16 %v819_v15, %v819_v15  ;;  %v2227_v15 = vld [vmem:[%s3397_s15 + $0x13c] sm:$0xf0] }
 0x266   :  { %v2230_v19 = vor.u32 %v2431_v14, %v2227_v15  ;;  %1441 = vmatpush.bf16.msrb.mxu1 %v2170_v21  ;;  %v2266_v14 = vor.u32 %v2439_v8, %v2263_v9  ;;  %v2270_v15 = vor.u32 %v2443_v11, %v2269_v10  ;;  %v2432_v21 = vld [vmem:[%s3397_s15 + $0x12c] sm:$0xf]  ;;  %v2401_v8 = vld [vmem:[%s3397_s15 + $0x30] sm:$0xf0] }
 0x267   :  { %899 = vmatmul.bf16.vlgmr.msra.gmra.mxu1 %v839_v16  ;;  %v2162_v16 = vor.u32 %v2419_v5, %v2161_v4  ;;  %v2294_v4 = vor.u32 %v2446_v57, %v2291_v58  ;;  %v2298_v5 = vor.u32 %v2450_v61, %v2297_v60  ;;  %v2158_v57 = vor.u32 %v2415_v55, %v2157_v54  ;;  %v2121_v58 = vld [vmem:[%s3397_s15 + $0x48] sm:$0xf]  ;;  %v2404_v60 = vld [vmem:[%s3397_s15 + $0x4c] sm:$0xf] }
 0x268   :  { %1452 = vmatpush.bf16.msra.mxu2 %v2230_v19  ;;  %v2123_v61 = vld [vmem:[%s3397_s15 + $0x64] sm:$0xf0]  ;;  %v2102_v11 = vor.u32 %v2401_v8, %v2101_v7 }
 0x269   :  { %1415 = vmatpush.bf16.msrb.mxu3 %v2162_v16  ;;  %v2403_v16 = vld [vmem:[%s3397_s15 + $0x44] sm:$0xf] }
 0x26a   :  { %v820_v17 = vpop.f32.mrf.mxu0 }
 0x26b   :  { %v2133_v17 = vld [vmem:[%s3397_s15 + $0x70] sm:$0xf] }
 0x26c   :  { %v2134_v29 = vor.u32 %v2412_v18, %v2133_v17  ;;  %v2115_v17 = vld [vmem:[%s3397_s15 + $0x5c] sm:$0xf0]  ;;  %v2233_v18 = vld [vmem:[%s3397_s15 + $0x128] sm:$0xf] }
 0x26d   :  { %v2118_v19 = vor.u32 %v2403_v16, %v2115_v17 }
 0x26e   :  { %1416 = vmatpush.bf16.msrb.mxu3 %v2134_v29  ;;  %v2087_v29 = vld [vmem:[%s3397_s15 + $0x24] sm:$0xf0] }
 0x272   :  { %1417 = vmatpush.bf16.msrb.mxu3 %v2106_v41  ;;  %v2421_v41 = vld [vmem:[%s3397_s15 + $0xd0] sm:$0xf0] }
 0x273   :  { %v2178_v43 = vor.u32 %v2421_v41, %v2177_v40 }
 0x276   :  { %1418 = vmatpush.bf16.msrb.mxu3 %v2078_v63  ;;  %v2408_v63 = vld [vmem:[%s3397_s15 + $0x68] sm:$0xf0] }
 0x2e4   :  { %v900_v24 = vpop.f32.mrf.mxu1 }
 0x2e5   :  { %v901_v25 = vadd.f32 %v2458_v23, %v900_v24  ;;  %v2424_v23 = vld [vmem:[%s3397_s15 + $0xec] sm:$0xf]  ;;  %v2199_v24 = vld [vmem:[%s3397_s15 + $0x104] sm:$0xf0] }
 0x2e6   :  { %v2202_v32 = vor.u32 %v2424_v23, %v2199_v24  ;;  %v2234_v23 = vor.u32 %v2435_v20, %v2233_v18  ;;  %v1106_v18 = vld [vmem:[%s3398_s16] sm:$0x7f] }
 0x2e7   :  { %v904_v26 = vmax.f32 %v901_v25, 0.0  ;;  %v2135_v25 = vld [vmem:[%s3397_s15 + $0x8c] sm:$0xf0]  ;;  %v1111_v20 = vperm.slane %v1106_v18, 2  ;;  %v1114_v41 = vperm.slane %v1106_v18, 5  ;;  %v1113_v55 = vperm.slane %v1106_v18, 4 }
 0x2e8   :  { %v2138_v33 = vor.u32 %v2409_v22, %v2135_v25  ;;  %1453 = vmatpush.bf16.msra.mxu2 %v2202_v32  ;;  %v2235_v22 = vld [vmem:[%s3397_s15 + $0x144] sm:$0xf0]  ;;  %v2241_v25 = vld [vmem:[%s3397_s15 + $0x130] sm:$0xf]  ;;  %v2428_v32 = vld [vmem:[%s3397_s15 + $0x108] sm:$0xf0] }
 0x2e9   :  { %v922_v27 = vpack.c.bf16 %v904_v26, %v904_v26  ;;  %v2141_v26 = vld [vmem:[%s3397_s15 + $0x78] sm:$0xf]  ;;  %v2238_v24 = vor.u32 %v2432_v21, %v2235_v22  ;;  %v2206_v35 = vor.u32 %v2428_v32, %v2205_v30 }
 0x2ea   :  { %1429 = vmatpush.bf16.msrb.mxu0 %v2138_v33  ;;  %v2425_v33 = vld [vmem:[%s3397_s15 + $0xf4] sm:$0xf] }
 0x2eb   :  { %982 = vmatmul.bf16.vlgmr.msrb.gmra.mxu2 %v922_v27  ;;  %v2413_v27 = vld [vmem:[%s3397_s15 + $0x90] sm:$0xf0] }
 0x2ec   :  { %v902_v28 = vpop.f32.mrf.mxu1  ;;  %v2142_v34 = vor.u32 %v2413_v27, %v2141_v26  ;;  %1454 = vmatpush.bf16.msra.mxu2 %v2174_v45  ;;  %v2436_v26 = vld [vmem:[%s3397_s15 + $0x148] sm:$0xf0]  ;;  %v2185_v45 = vld [vmem:[%s3397_s15 + $0xc0] sm:$0xf] }
 0x2ed   :  { %v2459_v28 = vld [vmem:[%s3394_s12] ss:$0 sm:$0xff]  ;;  %v2242_v27 = vor.u32 %v2436_v26, %v2241_v25  ;;  %v1109_v26 = vperm.slane %v1106_v18, 0 }
 0x2ee   :  { %1442 = vmatpush.bf16.msrb.mxu1 %v2142_v34  ;;  %1430 = vmatpush.bf16.msrb.mxu0 %v2110_v47  ;;  %v2207_v34 = vld [vmem:[%s3397_s15 + $0x10c] sm:$0xf0]  ;;  %v2182_v47 = vor.u32 %v2418_v42, %v2179_v44 }
 0x2ef   :  { %v2210_v36 = vor.u32 %v2425_v33, %v2207_v34 }
 0x2f0   :  { %1455 = vmatpush.bf16.msra.mxu2 %v2146_v62  ;;  %v2129_v62 = vld [vmem:[%s3397_s15 + $0x50] sm:$0xf] }
 0x2f2   :  { %1443 = vmatpush.bf16.msrb.mxu1 %v2114_v48  ;;  %1431 = vmatpush.bf16.msrb.mxu0 %v2082_v0 }
 0x2f4   :  { %1456 = vmatpush.bf16.msra.mxu2 %v2118_v19  ;;  %v1110_v19 = vperm.slane %v1106_v18, 1 }
 0x2f6   :  { %1444 = vmatpush.bf16.msrb.mxu1 %v2086_v2  ;;  %1476 = vmatpush.bf16.msra.mxu0 %v2294_v4  ;;  %v2130_v2 = vor.u32 %v2408_v63, %v2129_v62  ;;  %v2400_v4 = vld [vmem:[%s3397_s15 + $0x28] sm:$0xf0] }
 0x2fa   :  { %1489 = vmatpush.bf16.msra.mxu1 %v2298_v5  ;;  %1477 = vmatpush.bf16.msra.mxu0 %v2266_v14  ;;  %v2397_v5 = vld [vmem:[%s3397_s15 + $0x14] sm:$0xf] }
 0x2fb   :  { %v2098_v10 = vor.u32 %v2397_v5, %v2095_v6 }
 0x2fe   :  { %1490 = vmatpush.bf16.msra.mxu1 %v2270_v15  ;;  %1478 = vmatpush.bf16.msra.mxu0 %v2238_v24 }
 0x302   :  { %1491 = vmatpush.bf16.msra.mxu1 %v2242_v27  ;;  %1479 = vmatpush.bf16.msra.mxu0 %v2210_v36 }
 0x306   :  { %1492 = vmatpush.bf16.msra.mxu1 %v2214_v39  ;;  %1480 = vmatpush.bf16.msra.mxu0 %v2182_v47 }
 0x30a   :  { %1481 = vmatpush.bf16.msra.mxu0 %v2154_v56 }
 0x36e   :  { %v983_v46 = vpop.f32.mrf.mxu2 }
 0x36f   :  { %v984_v52 = vadd.f32 %v2459_v28, %v983_v46  ;;  %v2396_v28 = vld [vmem:[%s3397_s15 + $0xc] sm:$0xf]  ;;  %v2422_v46 = vld [vmem:[%s3397_s15 + $0xd8] sm:$0xf0] }
 0x370   :  { %v2090_v31 = vor.u32 %v2396_v28, %v2087_v29  ;;  %v2186_v48 = vor.u32 %v2422_v46, %v2185_v45  ;;  %v1112_v28 = vperm.slane %v1106_v18, 3  ;;  %v1115_v45 = vperm.slane %v1106_v18, 6 }
 0x371   :  { %v987_v59 = vmax.f32 %v984_v52, 0.0  ;;  %v2150_v52 = vor.u32 %v2414_v50, %v2149_v49 }
 0x372   :  { %1457 = vmatpush.bf16.msra.mxu2 %v2090_v31  ;;  %1493 = vmatpush.bf16.msra.mxu1 %v2186_v48 }
 0x373   :  { %v997_v1 = vpack.c.bf16 %v987_v59, %v987_v59  ;;  %v2407_v59 = vld [vmem:[%s3397_s15 + $0x60] sm:$0xf0] }
 0x374   :  { %v2122_v0 = vor.u32 %v2407_v59, %v2121_v58 }
 0x375   :  { %2074 = vmatmul.msk.bf16.vlgmr.msra.gmra.mxu3 %vm722_vm1, %v997_v1  ;;  %v2126_v1 = vor.u32 %v2404_v60, %v2123_v61  ;;  %vm1647_vm1 = vcmask 1041408  }
 0x376   :  { %v985_v12 = vpop.f32.mrf.mxu2  ;;  %1463 = vmatpush.bf16.msra.mxu3 %v2290_v3  ;;  %1494 = vmatpush.bf16.msra.mxu1 %v2158_v57  ;;  %v2093_v3 = vld [vmem:[%s3397_s15 + $0x10] sm:$0xf] }
 0x377   :  { %v2094_v9 = vor.u32 %v2400_v4, %v2093_v3  ;;  %1482 = vmatpush.bf16.msra.mxu0 %v2126_v1  ;;  %v2460_v12 = vld [vmem:[%s3396_s14] ss:$0 sm:$0xff] }
 0x37a   :  { %1464 = vmatpush.bf16.msra.mxu3 %v2262_v13  ;;  %1495 = vmatpush.bf16.msra.mxu1 %v2130_v2 }
 0x37b   :  { %1483 = vmatpush.bf16.msra.mxu0 %v2098_v10 }
 0x37e   :  { %1465 = vmatpush.bf16.msra.mxu3 %v2234_v23  ;;  %1496 = vmatpush.bf16.msra.mxu1 %v2102_v11 }
 0x382   :  { %1466 = vmatpush.bf16.msra.mxu3 %v2206_v35 }
 0x386   :  { %1467 = vmatpush.bf16.msra.mxu3 %v2178_v43 }
 0x38a   :  { %1468 = vmatpush.bf16.msra.mxu3 %v2150_v52 }
 0x38e   :  { %1469 = vmatpush.bf16.msra.mxu3 %v2122_v0 }
 0x392   :  { %1470 = vmatpush.bf16.msra.mxu3 %v2094_v9 }
 0x3f8   :  { %v1037_v13 = vpop.f32.mrf.mxu3 }
 0x3f9   :  { %v1038_v14 = vadd.f32 %v2460_v12, %v1037_v13 }
 0x3fb   :  { %v1041_v15 = vmax.f32 %v1038_v14, 0.0 }
 0x3fd   :  { %v1107_v16 = vpack.c.bf16 %v1041_v15, %v1041_v15 }
 0x3ff   :  { %1419 = vmatmul.bf16.vlgmr.msrb.gmra.mxu3 %v1107_v16  ;;  %1432 = vmatmul.bf16.vlgmr.msrb.gmra.mxu0 %v1107_v16 }
 0x400   :  { %1445 = vmatmul.bf16.vlgmr.msrb.gmra.mxu1 %v1107_v16  ;;  %1458 = vmatmul.bf16.vlgmr.msra.gmra.mxu2 %v1107_v16  ;;  %v1039_v17 = vpop.f32.mrf.mxu3 }
 0x40f   :  { %1471 = vmatmul.bf16.vlgmr.msra.gmra.mxu3 %v1107_v16  ;;  %1484 = vmatmul.bf16.vlgmr.msra.gmra.mxu0 %v1107_v16 }
 0x410   :  { %1497 = vmatmul.bf16.vlgmr.msra.gmra.mxu1 %v1107_v16 }
 0x47c   :  { %v1433_v21 = vpop.f32.mrf.mxu0 }
 0x47d   :  { %v1434_v22 = vadd.f32 %v1433_v21, %v1110_v19  ;;  %v1446_v23 = vpop.f32.mrf.mxu1 }
 0x47e   :  { %v1447_v24 = vadd.f32 %v1446_v23, %v1111_v20 }
 0x47f   :  { %v2300_v25 = vmul.f32 -1.442695, %v1434_v22 }
 0x480   :  { %v2301_v27 = vmul.f32 -1.442695, %v1447_v24 }
 0x481   :  { %2461 = vpow2.f32 %v2300_v25 }
 0x482   :  { %2463 = vpow2.f32 %v2301_v27  ;;  %v1420_v29 = vpop.f32.mrf.mxu3 }
 0x483   :  { %v1421_v30 = vadd.f32 %v1420_v29, %v1109_v26  ;;  %v1459_v31 = vpop.f32.mrf.mxu2 }
 0x484   :  { %v1460_v32 = vadd.f32 %v1459_v31, %v1112_v28  ;;  %v1435_v33 = vpop.f32.mrf.mxu0 }
 0x485   :  { %v2299_v34 = vmul.f32 -1.442695, %v1421_v30  ;;  %v1448_v35 = vpop.f32.mrf.mxu1 }
 0x486   :  { %v2302_v36 = vmul.f32 -1.442695, %v1460_v32 }
 0x487   :  { %v2462_v37 = vpop.eup %2461  ;;  %2465 = vpow2.f32 %v2299_v34 }
 0x488   :  { %v2464_v38 = vpop.eup %2463  ;;  %v1524_v39 = vadd.f32 1.0, %v2462_v37  ;;  %2467 = vpow2.f32 %v2302_v36 }
 0x489   :  { %v3261_v40 = vadd.f32 1.0, %v2464_v38 }
 0x48a   :  { %2469 = vrcp.f32 %v1524_v39  ;;  %v1422_v42 = vpop.f32.mrf.mxu3  ;;  %v1554_v61 = vand.u32 2147483647, %v1524_v39  ;;  %v1556_v62 = vand.u32 2147483648, %v1524_v39  ;;  %vm1550_vm2 = vweird.f32 %v1524_v39 }
 0x48b   :  { %2471 = vrcp.f32 %v3261_v40  ;;  %v1461_v43 = vpop.f32.mrf.mxu2  ;;  %vm1565_vm3 = vweird.f32 %v3261_v40  ;;  %v1569_v10 = vand.u32 2147483647, %v3261_v40  ;;  %v1571_v11 = vand.u32 2147483648, %v3261_v40 }
 0x48c   :  { %v1485_v44 = vpop.f32.mrf.mxu0  ;;  %vm3280_vm4 = vcmp.eq.f32.partialorder %v1554_v61, 8.507059e+37  ;;  %v1557_v14 = vor.u32 1.1754944e-38, %v1556_v62 }
 0x48d   :  { %v2466_v46 = vpop.eup %2465  ;;  %v1486_v47 = vadd.f32 %v1485_v44, %v1114_v41  ;;  %v1498_v48 = vpop.f32.mrf.mxu1  ;;  %vm1570_vm12 = vcmp.eq.f32.partialorder %v1569_v10, 8.507059e+37  ;;  %v1572_v35 = vor.u32 1.1754944e-38, %v1571_v11 }
 0x48e   :  { %v2468_v49 = vpop.eup %2467  ;;  %v3264_v50 = vadd.f32 1.0, %v2466_v46  ;;  %v1499_v54 = vadd.f32 %v1498_v48, %v1115_v45 }
 0x48f   :  { %v3266_v51 = vadd.f32 1.0, %v2468_v49  ;;  %v2304_v52 = vmul.f32 -1.442695, %v1486_v47 }
 0x490   :  { %v3268_v53 = vpop.eup %2469  ;;  %2473 = vrcp.f32 %v3264_v50  ;;  %v2305_v0 = vmul.f32 -1.442695, %v1499_v54  ;;  %vm1535_vm7 = vweird.f32 %v3264_v50  ;;  %v1539_v19 = vand.u32 2147483647, %v3264_v50 }
 0x491   :  { %v3271_v56 = vpop.eup %2471  ;;  %v1546_v57 = vmul.f32 %v3268_v53, %v1524_v39  ;;  %2475 = vrcp.f32 %v3266_v51  ;;  %vm1551_vm5 = vweird.f32 %v3268_v53  ;;  %v1541_v25 = vand.u32 2147483648, %v3264_v50 }
 0x492   :  { %v1561_v58 = vmul.f32 %v3271_v56, %v3261_v40  ;;  %v1472_v59 = vpop.f32.mrf.mxu3  ;;  %2477 = vpow2.f32 %v2304_v52  ;;  %vm1566_vm6 = vweird.f32 %v3271_v56  ;;  %vm3297_vm8 = vmor %vm1550_vm2, %vm1551_vm5  ;;  %v1586_v26 = vand.u32 2147483648, %v3266_v51 }
 0x493   :  { %v1547_v60 = vsub.f32 1.0, %v1546_v57  ;;  %v1473_v1 = vadd.f32 %v1472_v59, %v1113_v55  ;;  %2479 = vpow2.f32 %v2305_v0  ;;  %vm3310_vm10 = vmor %vm1565_vm3, %vm1566_vm6  ;;  %v1584_v33 = vand.u32 2147483647, %v3266_v51 }
 0x494   :  { %v1562_v63 = vsub.f32 1.0, %v1561_v58  ;;  %v1487_v2 = vpop.f32.mrf.mxu0  ;;  %vm1580_vm14 = vweird.f32 %v3266_v51  ;;  %v1542_v40 = vor.u32 1.1754944e-38, %v1541_v25  ;;  %vm1540_vm0 = vcmp.eq.f32.partialorder %v1539_v19, 8.507059e+37 }
 0x495   :  { %v1548_v3 = vmul.f32 %v3268_v53, %v1547_v60  ;;  %v1500_v4 = vpop.f32.mrf.mxu1  ;;  %v2303_v7 = vmul.f32 -1.442695, %v1473_v1  ;;  %v1587_v43 = vor.u32 1.1754944e-38, %v1586_v26  ;;  %vm1649_vm2 = vcmask 1045508  }
 0x496   :  { %v2474_v5 = vpop.eup %2473  ;;  %v1563_v6 = vmul.f32 %v3271_v56, %v1562_v63  ;;  %vm1585_vm3 = vcmp.eq.f32.partialorder %v1584_v33, 8.507059e+37  ;;  %vm1655_vm5 = vcmask 1043458   ;;  %vm1651_vm6 = vcmask 1043456  }
 0x497   :  { %v2476_v8 = vpop.eup %2475  ;;  %v1531_v12 = vmul.f32 %v2474_v5, %v3264_v50  ;;  %v1549_v13 = vadd.f32 %v3268_v53, %v1548_v3  ;;  %2481 = vpow2.f32 %v2303_v7  ;;  %vm1536_vm9 = vweird.f32 %v2474_v5 }
 0x498   :  { %v1576_v15 = vmul.f32 %v2476_v8, %v3266_v51  ;;  %v2478_v16 = vpop.eup %2477  ;;  %v1564_v17 = vadd.f32 %v3271_v56, %v1563_v6  ;;  %vm1581_vm11 = vweird.f32 %v2476_v8  ;;  %vm1537_vm13 = vmor %vm1535_vm7, %vm1536_vm9  ;;  %vm1659_vm7 = vcmask 1045506  }
 0x499   :  { %v1532_v18 = vsub.f32 1.0, %v1531_v12  ;;  %v3294_v21 = vadd.f32 1.0, %v2478_v16  ;;  %v2480_v27 = vpop.eup %2479  ;;  %v1553_v28 = vsel %vm3297_vm8, %v3268_v53, %v1549_v13  ;;  %vm1582_vm15 = vmor %vm1580_vm14, %vm1581_vm11 }
 0x49a   :  { %v1577_v20 = vsub.f32 1.0, %v1576_v15  ;;  %v1474_v22 = vpop.f32.mrf.mxu3  ;;  %v1568_v31 = vsel %vm3310_vm10, %v3271_v56, %v1564_v17  ;;  %v3319_v34 = vadd.f32 1.0, %v2480_v27  ;;  %v1558_v38 = vsel %vm3280_vm4, %v1557_v14, %v1553_v28 }
 0x49b   :  { %v1533_v24 = vmul.f32 %v2474_v5, %v1532_v18  ;;  %2483 = vrcp.f32 %v3294_v21  ;;  %v1573_v41 = vsel %vm1570_vm12, %v1572_v35, %v1568_v31  ;;  %v1642_v46 = vrot.slane %v1558_v38, 6 }
 0x49c   :  { %v1578_v30 = vmul.f32 %v2476_v8, %v1577_v20  ;;  %2485 = vrcp.f32 %v3319_v34  ;;  %v1643_v49 = vrot.slane %v1573_v41, 4  ;;  %vm1657_vm4 = vcmask 1045504  }
 0x49d   :  { %v1534_v32 = vadd.f32 %v2474_v5, %v1533_v24  ;;  %v2482_v37 = vpop.eup %2481  ;;  %v1614_v6 = vand.u32 2147483647, %v3294_v21  ;;  %v1616_v7 = vand.u32 2147483648, %v3294_v21  ;;  %vm1610_vm10 = vweird.f32 %v3294_v21 }
 0x49e   :  { %v1579_v36 = vadd.f32 %v2476_v8, %v1578_v30  ;;  %v3331_v48 = vadd.f32 1.0, %v2482_v37  ;;  %v1631_v13 = vand.u32 2147483648, %v3319_v34  ;;  %vm1625_vm12 = vweird.f32 %v3319_v34 }
 0x49f   :  { %v1538_v39 = vsel %vm1537_vm13, %v2474_v5, %v1534_v32  ;;  %v1629_v17 = vand.u32 2147483647, %v3319_v34  ;;  %vm1615_vm14 = vcmp.eq.f32.partialorder %v1614_v6, 8.507059e+37  ;;  %v1617_v20 = vor.u32 1.1754944e-38, %v1616_v7 }
 0x4a0   :  { %v1583_v42 = vsel %vm1582_vm15, %v2476_v8, %v1579_v36  ;;  %v1543_v44 = vsel %vm1540_vm0, %v1542_v40, %v1538_v39  ;;  %2487 = vrcp.f32 %v3331_v48  ;;  %v1601_v22 = vand.u32 2147483648, %v3331_v48 }
 0x4a1   :  { %v3329_v45 = vpop.eup %2483  ;;  %v1588_v47 = vsel %vm1585_vm3, %v1587_v43, %v1583_v42  ;;  %v1648_v52 = vsel %vm1647_vm1, %v1543_v44, %v1642_v46  ;;  %v1656_v54 = vsel %vm1655_vm5, %v1543_v44, %v1642_v46  ;;  %v1665_v58 = vsel %vm1649_vm2, %v1543_v44, %v1642_v46  ;;  %vm1688_vm3 = vmor %vm1655_vm5, %vm1647_vm1 }
 0x4a2   :  { %v1644_v50 = vrot.slane %v1588_v47, 2  ;;  %v1606_v51 = vmul.f32 %v3329_v45, %v3294_v21  ;;  %v2486_v53 = vpop.eup %2485  ;;  %v1672_v62 = vsel %vm1657_vm4, %v1642_v46, %v1543_v44  ;;  %vm1611_vm8 = vweird.f32 %v3329_v45 }
 0x4a3   :  { %v1621_v61 = vmul.f32 %v2486_v53, %v3319_v34  ;;  %vm1626_vm9 = vweird.f32 %v2486_v53  ;;  %vm3357_vm11 = vmor %vm1610_vm10, %vm1611_vm8  ;;  %v1632_v23 = vor.u32 1.1754944e-38, %v1631_v13  ;;  %v1599_v25 = vand.u32 2147483647, %v3331_v48 }
 0x4a4   :  { %v1650_v55 = vsel %vm1649_vm2, %v1643_v49, %v1644_v50  ;;  %v1658_v56 = vsel %vm1657_vm4, %v1644_v50, %v1643_v49  ;;  %v1666_v57 = vsel %vm1647_vm1, %v1643_v49, %v1644_v50  ;;  %v1673_v59 = vsel %vm1655_vm5, %v1643_v49, %v1644_v50  ;;  %vm1627_vm13 = vmor %vm1625_vm12, %vm1626_vm9 }
 0x4a5   :  { %v1607_v60 = vsub.f32 1.0, %v1606_v51  ;;  %v1652_v63 = vsel %vm1651_vm6, %v1648_v52, %v1650_v55  ;;  %v1660_v0 = vsel %vm1659_vm7, %v1656_v54, %v1658_v56  ;;  %v1667_v1 = vsel %vm1651_vm6, %v1666_v57, %v1665_v58 }
 0x4a6   :  { %v1622_v3 = vsub.f32 1.0, %v1621_v61  ;;  %v1661_v4 = vrot.slane %v1660_v0, 2  ;;  %v1668_v5 = vrot.slane %v1667_v1, 4  ;;  %1687 = vst [vmem:[#allocation2] sm:$0xff] %v1652_v63  ;;  %v1674_v8 = vsel %vm1659_vm7, %v1673_v59, %v1672_v62  ;;  %v2488_v9 = vpop.eup %2487 }
 0x4a7   :  { %v1608_v2 = vmul.f32 %v3329_v45, %v1607_v60  ;;  %v1675_v12 = vrot.slane %v1674_v8, 6  ;;  %v1591_v14 = vmul.f32 %v2488_v9, %v3331_v48  ;;  %vm1596_vm15 = vweird.f32 %v2488_v9 }
 0x4a8   :  { %v1623_v11 = vmul.f32 %v2486_v53, %v1622_v3  ;;  %1692 = vst [vmem:[#allocation2 + $0xe] sm:$0xff] %v1661_v4  ;;  %vm1630_vm0 = vcmp.eq.f32.partialorder %v1629_v17, 8.507059e+37  ;;  %vm1595_vm8 = vweird.f32 %v3331_v48  ;;  %vm1689_vm9 = vcmask 128004  }
 0x4a9   :  { %v1609_v10 = vadd.f32 %v3329_v45, %v1608_v2  ;;  %1694 = vst [vmem:[#allocation2 + $0x1c] sm:$0xff] %v1668_v5  ;;  %v1592_v19 = vsub.f32 1.0, %v1591_v14  ;;  %vm1597_vm10 = vmor %vm1595_vm8, %vm1596_vm15  ;;  %v1602_v29 = vor.u32 1.1754944e-38, %v1601_v22 }
 0x4aa   :  { %v1624_v16 = vadd.f32 %v2486_v53, %v1623_v11  ;;  %1696 = vst [vmem:[#allocation2 + $0x2a] sm:$0xff] %v1675_v12  ;;  %vm1690_vm12 = vmor %vm1689_vm9, %vm1688_vm3 }
 0x4ab   :  { %v1613_v18 = vsel %vm3357_vm11, %v3329_v45, %v1609_v10  ;;  %v1593_v24 = vmul.f32 %v2488_v9, %v1592_v19  ;;  %vm1600_vm11 = vcmp.eq.f32.partialorder %v1599_v25, 8.507059e+37 }
 0x4ac   :  { %v1628_v21 = vsel %vm1627_vm13, %v2486_v53, %v1624_v16  ;;  %v1618_v26 = vsel %vm1615_vm14, %v1617_v20, %v1613_v18 }
 0x4ad   :  { %v1633_v27 = vsel %vm1630_vm0, %v1632_v23, %v1628_v21  ;;  %v1594_v28 = vadd.f32 %v2488_v9, %v1593_v24  ;;  %v1645_v30 = vrot.slane %v1618_v26, 6 }
 0x4ae   :  { %v1646_v32 = vrot.slane %v1633_v27, 4 }
 0x4af   :  { %v1598_v31 = vsel %vm1597_vm10, %v2488_v9, %v1594_v28 }
 0x4b0   :  { %v1603_v33 = vsel %vm1600_vm11, %v1602_v29, %v1598_v31 }
 0x4b1   :  { %v1653_v34 = vsel %vm1647_vm1, %v1603_v33, %v1645_v30  ;;  %v1662_v35 = vsel %vm1655_vm5, %v1603_v33, %v1645_v30  ;;  %v1669_v36 = vsel %vm1649_vm2, %v1603_v33, %v1645_v30  ;;  %v1676_v37 = vsel %vm1657_vm4, %v1645_v30, %v1603_v33 }
 0x4b2   :  { %v1654_v38 = vsel %vm1651_vm6, %v1653_v34, %v1646_v32  ;;  %v1663_v39 = vsel %vm1659_vm7, %v1662_v35, %v1646_v32  ;;  %v1670_v40 = vsel %vm1651_vm6, %v1646_v32, %v1669_v36  ;;  %v1677_v41 = vsel %vm1659_vm7, %v1646_v32, %v1676_v37 }
 0x4b3   :  { %v1664_v42 = vrot.slane %v1663_v39, 2  ;;  %v1671_v43 = vrot.slane %v1670_v40, 4  ;;  %v1678_v44 = vrot.slane %v1677_v41, 6  ;;  %1691 = vst.msk [vmem:[#allocation2 + $0x8] sm:$0x3f] %vm1690_vm12, %v1654_v38 }
 0x4b5   :  { %1693 = vst.msk [vmem:[#allocation2 + $0x16] sm:$0x3f] %vm1690_vm12, %v1664_v42 }
 0x4b6   :  { %1695 = vst.msk [vmem:[#allocation2 + $0x24] sm:$0x3f] %vm1690_vm12, %v1671_v43 }
 0x4b7   :  { %1697 = vst.msk [vmem:[#allocation2 + $0x32] sm:$0x3f] %vm1690_vm12, %v1678_v44 }
 0x4b8   :  { %1701 = vsyncadd [#allocation3], 672  ;;  %s1704_s1 = sshll.u32 %s3399_s17, 4  ;;  %s2515_s29 = smov [#allocation2]   ;;  %s1705_s1 = int_to_ptr.hbm [resolvable:$true] %s1704_s1 }
 0x4b9   :  { %s1702_s12 = sshll.u32 %s2515_s29, 4  ;;  %s2516_s8 = smov 224   ;;  %s1703_s12 = int_to_ptr.vmem [resolvable:$true] %s1702_s12 }
 0x4ba   :  { %s2517_s3 = smov 14  }
 0x4bb   :  { %1710 = dma.vmem_to_hbm [thread:$0]  %s1703_s12, 224, %s1705_s1, [#allocation3], %s2516_s8, %s2516_s8, %s2517_s3  }
 0x4bc   :  { %2513 = dma.done.wait [#allocation3], 896  }
 0x4bd   :  { %2514 = vsyncadd [#allocation3], 4294966400 }
 0x4be   :  { %1715 = vsyncpa [#allocation3], 1 }

</bundles_post_ra>
